<compile_context>
chip_gen: v7x
topology: tpu7x:2x2x1
jax: 0.10.0
libtpu: 0.0.40
codegen_flags: <defaults>
</compile_context>

<pallas_src>
import functools

import jax
import jax.numpy as jnp
from jax.experimental import pallas as pl
from jax.experimental.pallas import tpu as pltpu

HIDDEN = 100
HP = 128                      # lane-padded hidden size
FC1_IN = 1000                 # fc1 = nn.Linear(1000, 256) => seq_len * HIDDEN = 1000
SEQ_LEN = FC1_IN // HIDDEN    # = 10
FC1_OUT = 256
OUT_PAD = 128                 # lane-dense padded output width


def _pad_axis(a, axis, new_size):
    pad = [(0, 0)] * a.ndim
    pad[axis] = (0, new_size - a.shape[axis])
    return jnp.pad(a, pad)


# ----------------------------------------------------------------------------
# Pallas kernel: full forward pass (LSTM recurrence + fc1 + fc2)
# ----------------------------------------------------------------------------
def lstm_regressor_kernel(x_ref,        # (T*BP, I)      bf16, time-major rows (t*BP + b)
                          wih_ref,      # (I, 4*HP)      bf16, W_ih^T gate-padded
                          whh_ref,      # (HP, 4*HP)     bf16, W_hh^T gate-padded
                          b_ref,        # (1, 4*HP)      f32,  b_ih + b_hh gate-padded
                          wfc1_ref,     # (T*HP, 256)    bf16, W_fc1^T row-padded per timestep
                          bfc1_ref,     # (1, 256)       f32
                          wfc2_ref,     # (256, OUT_PAD) bf16, W_fc2^T col-padded
                          bfc2_ref,     # (1, OUT_PAD)   f32
                          y_ref,        # (BP, OUT_PAD)  f32 output (lane-dense)
                          hall_sc):     # (BP, T*HP)     bf16 scratch: all hidden states
    BP = y_ref.shape[0]
    T = SEQ_LEN

    # Hoisted input projection + bias: one matmul for ALL timesteps (no serial dependency).
    gx = (jnp.dot(x_ref[...], wih_ref[...], preferred_element_type=jnp.float32)
          + b_ref[...])                                            # (T*BP, 4*HP) f32

    whh = whh_ref[...]                                             # (HP, 4*HP) bf16

    # h/c live in vregs; fully unrolled loop (static offsets, LLO can overlap MXU/EUP).
    h = jnp.zeros((BP, HP), jnp.float32)
    c = jnp.zeros((BP, HP), jnp.float32)
    for t in range(T):
        gates = (gx[t * BP:(t + 1) * BP, :]
                 + jnp.dot(h.astype(jnp.bfloat16), whh,
                           preferred_element_type=jnp.float32))    # (BP, 4*HP)

        # PyTorch LSTM gate order: i, f, g, o — each gate is exactly one 128-lane tile.
        i_g = jax.nn.sigmoid(gates[:, 0 * HP:1 * HP])
        f_g = jax.nn.sigmoid(gates[:, 1 * HP:2 * HP])
        g_g = jnp.tanh(gates[:, 2 * HP:3 * HP])
        o_g = jax.nn.sigmoid(gates[:, 3 * HP:4 * HP])

        c = f_g * c + i_g * g_g
        h = o_g * jnp.tanh(c)

        # Stash h_t for the deferred fc1 matmul (static, lane-aligned slice store).
        hall_sc[:, t * HP:(t + 1) * HP] = h.astype(jnp.bfloat16)

    # Deferred "flatten + fc1": one (BP, T*HP) @ (T*HP, 256) matmul (padded rows are zero).
    fc1 = (jnp.dot(hall_sc[...], wfc1_ref[...],
                   preferred_element_type=jnp.float32)
           + bfc1_ref[...])                                        # (BP, 256)
    y = (jnp.dot(fc1.astype(jnp.bfloat16), wfc2_ref[...],
                 preferred_element_type=jnp.float32)
         + bfc2_ref[...])                                          # (BP, OUT_PAD)
    y_ref[...] = y


# ----------------------------------------------------------------------------
# One-time parameter preparation (transpose / gate-pad / cast) — hoisted out of
# the per-call path.
# ----------------------------------------------------------------------------
def prepare_params(params):
    I = params["w_ih"].shape[1]
    G = 4

    # W_ih: (4H, I) -> pad each gate block 100 -> 128 -> (I, 4*HP) bf16
    w_ih = params["w_ih"].reshape(G, HIDDEN, I)
    w_ih = _pad_axis(w_ih, 1, HP).reshape(G * HP, I)
    wih_t = w_ih.T.astype(jnp.bfloat16)

    # W_hh: (4H, H) -> pad gate-out and h-in dims to 128 -> (HP, 4*HP) bf16
    w_hh = params["w_hh"].reshape(G, HIDDEN, HIDDEN)
    w_hh = _pad_axis(_pad_axis(w_hh, 1, HP), 2, HP).reshape(G * HP, HP)
    whh_t = w_hh.T.astype(jnp.bfloat16)

    # combined bias, gate-padded
    b = (params["b_ih"] + params["b_hh"]).reshape(G, HIDDEN)
    b = _pad_axis(b, 1, HP).reshape(1, G * HP).astype(jnp.float32)

    # W_fc1^T: (1000, 256) -> (T, 100, 256) -> pad H to 128 -> (T*HP, 256) bf16
    w_fc1 = params["w_fc1"].T.reshape(SEQ_LEN, HIDDEN, FC1_OUT)
    w_fc1 = _pad_axis(w_fc1, 1, HP).reshape(SEQ_LEN * HP, FC1_OUT).astype(jnp.bfloat16)
    b_fc1 = params["b_fc1"].reshape(1, FC1_OUT).astype(jnp.float32)

    # W_fc2^T: (256, O) -> pad O to OUT_PAD -> bf16
    w_fc2 = _pad_axis(params["w_fc2"].T, 1, OUT_PAD).astype(jnp.bfloat16)
    b_fc2 = _pad_axis(params["b_fc2"], 0, OUT_PAD).reshape(1, OUT_PAD).astype(jnp.float32)

    return {"wih_t": wih_t, "whh_t": whh_t, "b": b,
            "w_fc1": w_fc1, "b_fc1": b_fc1, "w_fc2": w_fc2, "b_fc2": b_fc2}


# ----------------------------------------------------------------------------
# Forward wrapper (jitted): x plumbing + pallas_call + unpad
# ----------------------------------------------------------------------------
@functools.partial(jax.jit, static_argnames=("out_size",))
def lstm_regressor_forward(x, prep, *, out_size):
    """x: (B, T, I) float32 (batch-first, like the PyTorch module)."""
    B, T, I = x.shape
    assert T == SEQ_LEN, f"fc1 expects {FC1_IN} features => seq_len must be {SEQ_LEN}"

    BP = max(8, ((B + 7) // 8) * 8)                 # pad batch to full f32 sublanes
    x_tm = jnp.transpose(x, (1, 0, 2))              # (T, B, I) time-major
    x_tm = _pad_axis(x_tm.astype(jnp.float32), 1, BP)
    x2d = x_tm.reshape(T * BP, I).astype(jnp.bfloat16)

    vmem = pl.BlockSpec(memory_space=pltpu.MemorySpace.VMEM)
    y_pad = pl.pallas_call(
        lstm_regressor_kernel,
        out_shape=jax.ShapeDtypeStruct((BP, OUT_PAD), jnp.float32),
        in_specs=[vmem] * 8,
        out_specs=vmem,
        scratch_shapes=[pltpu.VMEM((BP, SEQ_LEN * HP), jnp.bfloat16)],
    )(x2d, prep["wih_t"], prep["whh_t"], prep["b"],
      prep["w_fc1"], prep["b_fc1"], prep["w_fc2"], prep["b_fc2"])

    return y_pad[:B, :out_size]


# ----------------------------------------------------------------------------
# Deterministic parameter init (PyTorch-style uniform ranges)
# ----------------------------------------------------------------------------
def init_params(key, input_size, output_size):
    ks = jax.random.split(key, 8)
    s_lstm = 1.0 / jnp.sqrt(jnp.float32(HIDDEN))
    s_fc1 = 1.0 / jnp.sqrt(jnp.float32(FC1_IN))
    s_fc2 = 1.0 / jnp.sqrt(jnp.float32(FC1_OUT))
    u = lambda k, shp, s: jax.random.uniform(k, shp, jnp.float32, -s, s)
    return {
        "w_ih": u(ks[0], (4 * HIDDEN, input_size), s_lstm),
        "w_hh": u(ks[1], (4 * HIDDEN, HIDDEN), s_lstm),
        "b_ih": u(ks[2], (4 * HIDDEN,), s_lstm),
        "b_hh": u(ks[3], (4 * HIDDEN,), s_lstm),
        "w_fc1": u(ks[4], (FC1_OUT, FC1_IN), s_fc1),
        "b_fc1": u(ks[5], (FC1_OUT,), s_fc1),
        "w_fc2": u(ks[6], (output_size, FC1_OUT), s_fc2),
        "b_fc2": u(ks[7], (output_size,), s_fc2),
    }


# ----------------------------------------------------------------------------
# Pure-JAX f32 reference (mirrors the PyTorch forward exactly)
# ----------------------------------------------------------------------------
def reference_forward(x, params):
    B, T, I = x.shape
    h = jnp.zeros((B, HIDDEN), jnp.float32)
    c = jnp.zeros((B, HIDDEN), jnp.float32)
    wih_t = params["w_ih"].T
    whh_t = params["w_hh"].T
    b = params["b_ih"] + params["b_hh"]
    outs = []
    for t in range(T):
        gates = x[:, t, :] @ wih_t + h @ whh_t + b
        i_g = jax.nn.sigmoid(gates[:, 0 * HIDDEN:1 * HIDDEN])
        f_g = jax.nn.sigmoid(gates[:, 1 * HIDDEN:2 * HIDDEN])
        g_g = jnp.tanh(gates[:, 2 * HIDDEN:3 * HIDDEN])
        o_g = jax.nn.sigmoid(gates[:, 3 * HIDDEN:4 * HIDDEN])
        c = f_g * c + i_g * g_g
        h = o_g * jnp.tanh(c)
        outs.append(h)
    out = jnp.stack(outs, axis=1).reshape(B, -1)          # (B, T*H) = (B, 1000)
    out = out @ params["w_fc1"].T + params["b_fc1"]        # (B, 256)
    out = out @ params["w_fc2"].T + params["b_fc2"]        # (B, O)
    return out


if __name__ == "__main__":
    B, T, I, O = 2, SEQ_LEN, 16, 8      # seq_len = 10 is forced by fc1(1000, 256)

    key = jax.random.PRNGKey(0)
    k_x, k_p = jax.random.split(key)
    x = jax.random.normal(k_x, (B, T, I), jnp.float32)
    params = init_params(k_p, input_size=I, output_size=O)

    prep = prepare_params(params)       # one-time weight prep (hoisted out of the call path)

    y = lstm_regressor_forward(x, prep, out_size=O)
    y = jax.block_until_ready(y)

    y_ref = jax.block_until_ready(reference_forward(x, params))
    assert y.shape == (B, O)
    # bf16 MXU operands with f32 accumulation -> compare with a bf16-appropriate tolerance.
    assert jnp.allclose(y, y_ref, rtol=2e-2, atol=2e-2), (
        f"mismatch: max abs err {jnp.max(jnp.abs(y - y_ref))}")

    print("KERNEL_OK")
</pallas_src>

<mosaic_0001>
module attributes {stable_mosaic.version = 11 : i64} {
  func.func @lstm_regressor_kernel(%arg0: memref<80x16xbf16, #tpu.memory_space<vmem>>, %arg1: memref<16x512xbf16, #tpu.memory_space<vmem>>, %arg2: memref<128x512xbf16, #tpu.memory_space<vmem>>, %arg3: memref<1x512xf32, #tpu.memory_space<vmem>>, %arg4: memref<1280x256xbf16, #tpu.memory_space<vmem>>, %arg5: memref<1x256xf32, #tpu.memory_space<vmem>>, %arg6: memref<256x128xbf16, #tpu.memory_space<vmem>>, %arg7: memref<1x128xf32, #tpu.memory_space<vmem>>, %arg8: memref<8x128xf32, #tpu.memory_space<vmem>>, %arg9: memref<8x1280xbf16, #tpu.memory_space<vmem>>) attributes {dimension_semantics = [], scalar_prefetch = 0 : i64, scratch_operands = 1 : i64, tpu.core_type = #tpu.core_type<tc>} {
    %c0 = arith.constant 0 : index
    %c0_0 = arith.constant 0 : index
    %0 = vector.load %arg0[%c0, %c0_0] : memref<80x16xbf16, #tpu.memory_space<vmem>>, vector<80x16xbf16>
    %c0_1 = arith.constant 0 : index
    %c0_2 = arith.constant 0 : index
    %1 = vector.load %arg1[%c0_1, %c0_2] : memref<16x512xbf16, #tpu.memory_space<vmem>>, vector<16x512xbf16>
    %cst = arith.constant dense<0.000000e+00> : vector<80x512xf32>
    %2 = tpu.matmul %0, %1, %cst {dimension_numbers = #tpu.dot_dimension_numbers<[1], [0], [0], [1], [0, 0, 1, 1], [], []>} : vector<80x16xbf16>, vector<16x512xbf16>, vector<80x512xf32> -> vector<80x512xf32>
    %c0_3 = arith.constant 0 : index
    %c0_4 = arith.constant 0 : index
    %3 = vector.load %arg3[%c0_3, %c0_4] : memref<1x512xf32, #tpu.memory_space<vmem>>, vector<1x512xf32>
    %4 = vector.broadcast %3 : vector<1x512xf32> to vector<80x512xf32>
    %5 = arith.addf %2, %4 : vector<80x512xf32>
    %c0_5 = arith.constant 0 : index
    %c0_6 = arith.constant 0 : index
    %6 = vector.load %arg2[%c0_5, %c0_6] : memref<128x512xbf16, #tpu.memory_space<vmem>>, vector<128x512xbf16>
    %cst_7 = arith.constant 0.000000e+00 : f32
    %7 = vector.broadcast %cst_7 : f32 to vector<8x128xf32>
    %cst_8 = arith.constant 0.000000e+00 : f32
    %8 = vector.broadcast %cst_8 : f32 to vector<8x128xf32>
    %9 = vector.extract_strided_slice %5 {offsets = [0, 0], sizes = [8, 512], strides = [1, 1]} : vector<80x512xf32> to vector<8x512xf32>
    %10 = arith.truncf %7 : vector<8x128xf32> to vector<8x128xbf16>
    %cst_9 = arith.constant dense<0.000000e+00> : vector<8x512xf32>
    %11 = tpu.matmul %10, %6, %cst_9 {dimension_numbers = #tpu.dot_dimension_numbers<[1], [0], [0], [1], [0, 0, 1, 1], [], []>} : vector<8x128xbf16>, vector<128x512xbf16>, vector<8x512xf32> -> vector<8x512xf32>
    %12 = arith.addf %9, %11 : vector<8x512xf32>
    %13 = vector.extract_strided_slice %12 {offsets = [0, 0], sizes = [8, 128], strides = [1, 1]} : vector<8x512xf32> to vector<8x128xf32>
    %14 = arith.negf %13 : vector<8x128xf32>
    %15 = math.exp %14 : vector<8x128xf32>
    %cst_10 = arith.constant 1.000000e+00 : f32
    %16 = vector.broadcast %cst_10 : f32 to vector<8x128xf32>
    %17 = arith.addf %16, %15 : vector<8x128xf32>
    %18 = arith.divf %16, %17 : vector<8x128xf32>
    %19 = vector.extract_strided_slice %12 {offsets = [0, 128], sizes = [8, 128], strides = [1, 1]} : vector<8x512xf32> to vector<8x128xf32>
    %20 = arith.negf %19 : vector<8x128xf32>
    %21 = math.exp %20 : vector<8x128xf32>
    %cst_11 = arith.constant 1.000000e+00 : f32
    %22 = vector.broadcast %cst_11 : f32 to vector<8x128xf32>
    %23 = arith.addf %22, %21 : vector<8x128xf32>
    %24 = arith.divf %22, %23 : vector<8x128xf32>
    %25 = vector.extract_strided_slice %12 {offsets = [0, 256], sizes = [8, 128], strides = [1, 1]} : vector<8x512xf32> to vector<8x128xf32>
    %26 = math.tanh %25 : vector<8x128xf32>
    %27 = vector.extract_strided_slice %12 {offsets = [0, 384], sizes = [8, 128], strides = [1, 1]} : vector<8x512xf32> to vector<8x128xf32>
    %28 = arith.negf %27 : vector<8x128xf32>
    %29 = math.exp %28 : vector<8x128xf32>
    %cst_12 = arith.constant 1.000000e+00 : f32
    %30 = vector.broadcast %cst_12 : f32 to vector<8x128xf32>
    %31 = arith.addf %30, %29 : vector<8x128xf32>
    %32 = arith.divf %30, %31 : vector<8x128xf32>
    %33 = arith.mulf %24, %8 : vector<8x128xf32>
    %34 = arith.mulf %18, %26 : vector<8x128xf32>
    %35 = arith.addf %33, %34 : vector<8x128xf32>
    %36 = math.tanh %35 : vector<8x128xf32>
    %37 = arith.mulf %32, %36 : vector<8x128xf32>
    %38 = arith.truncf %37 : vector<8x128xf32> to vector<8x128xbf16>
    %c0_13 = arith.constant 0 : index
    %c0_14 = arith.constant 0 : index
    %39 = vector.load %arg9[%c0_13, %c0_14] : memref<8x1280xbf16, #tpu.memory_space<vmem>>, vector<8x128xbf16>
    tpu.vector_store %arg9[%c0_13, %c0_14], %38 {strides = array<i32>} : memref<8x1280xbf16, #tpu.memory_space<vmem>>, vector<8x128xbf16>,
    %40 = vector.extract_strided_slice %5 {offsets = [8, 0], sizes = [8, 512], strides = [1, 1]} : vector<80x512xf32> to vector<8x512xf32>
    %41 = arith.truncf %37 : vector<8x128xf32> to vector<8x128xbf16>
    %cst_15 = arith.constant dense<0.000000e+00> : vector<8x512xf32>
    %42 = tpu.matmul %41, %6, %cst_15 {dimension_numbers = #tpu.dot_dimension_numbers<[1], [0], [0], [1], [0, 0, 1, 1], [], []>} : vector<8x128xbf16>, vector<128x512xbf16>, vector<8x512xf32> -> vector<8x512xf32>
    %43 = arith.addf %40, %42 : vector<8x512xf32>
    %44 = vector.extract_strided_slice %43 {offsets = [0, 0], sizes = [8, 128], strides = [1, 1]} : vector<8x512xf32> to vector<8x128xf32>
    %45 = arith.negf %44 : vector<8x128xf32>
    %46 = math.exp %45 : vector<8x128xf32>
    %cst_16 = arith.constant 1.000000e+00 : f32
    %47 = vector.broadcast %cst_16 : f32 to vector<8x128xf32>
    %48 = arith.addf %47, %46 : vector<8x128xf32>
    %49 = arith.divf %47, %48 : vector<8x128xf32>
    %50 = vector.extract_strided_slice %43 {offsets = [0, 128], sizes = [8, 128], strides = [1, 1]} : vector<8x512xf32> to vector<8x128xf32>
    %51 = arith.negf %50 : vector<8x128xf32>
    %52 = math.exp %51 : vector<8x128xf32>
    %cst_17 = arith.constant 1.000000e+00 : f32
    %53 = vector.broadcast %cst_17 : f32 to vector<8x128xf32>
    %54 = arith.addf %53, %52 : vector<8x128xf32>
    %55 = arith.divf %53, %54 : vector<8x128xf32>
    %56 = vector.extract_strided_slice %43 {offsets = [0, 256], sizes = [8, 128], strides = [1, 1]} : vector<8x512xf32> to vector<8x128xf32>
    %57 = math.tanh %56 : vector<8x128xf32>
    %58 = vector.extract_strided_slice %43 {offsets = [0, 384], sizes = [8, 128], strides = [1, 1]} : vector<8x512xf32> to vector<8x128xf32>
    %59 = arith.negf %58 : vector<8x128xf32>
    %60 = math.exp %59 : vector<8x128xf32>
    %cst_18 = arith.constant 1.000000e+00 : f32
    %61 = vector.broadcast %cst_18 : f32 to vector<8x128xf32>
    %62 = arith.addf %61, %60 : vector<8x128xf32>
    %63 = arith.divf %61, %62 : vector<8x128xf32>
    %64 = arith.mulf %55, %35 : vector<8x128xf32>
    %65 = arith.mulf %49, %57 : vector<8x128xf32>
    %66 = arith.addf %64, %65 : vector<8x128xf32>
    %67 = math.tanh %66 : vector<8x128xf32>
    %68 = arith.mulf %63, %67 : vector<8x128xf32>
    %69 = arith.truncf %68 : vector<8x128xf32> to vector<8x128xbf16>
    %c0_19 = arith.constant 0 : index
    %c128 = arith.constant 128 : index
    %70 = vector.load %arg9[%c0_19, %c128] : memref<8x1280xbf16, #tpu.memory_space<vmem>>, vector<8x128xbf16>
    tpu.vector_store %arg9[%c0_19, %c128], %69 {strides = array<i32>} : memref<8x1280xbf16, #tpu.memory_space<vmem>>, vector<8x128xbf16>,
    %71 = vector.extract_strided_slice %5 {offsets = [16, 0], sizes = [8, 512], strides = [1, 1]} : vector<80x512xf32> to vector<8x512xf32>
    %72 = arith.truncf %68 : vector<8x128xf32> to vector<8x128xbf16>
    %cst_20 = arith.constant dense<0.000000e+00> : vector<8x512xf32>
    %73 = tpu.matmul %72, %6, %cst_20 {dimension_numbers = #tpu.dot_dimension_numbers<[1], [0], [0], [1], [0, 0, 1, 1], [], []>} : vector<8x128xbf16>, vector<128x512xbf16>, vector<8x512xf32> -> vector<8x512xf32>
    %74 = arith.addf %71, %73 : vector<8x512xf32>
    %75 = vector.extract_strided_slice %74 {offsets = [0, 0], sizes = [8, 128], strides = [1, 1]} : vector<8x512xf32> to vector<8x128xf32>
    %76 = arith.negf %75 : vector<8x128xf32>
    %77 = math.exp %76 : vector<8x128xf32>
    %cst_21 = arith.constant 1.000000e+00 : f32
    %78 = vector.broadcast %cst_21 : f32 to vector<8x128xf32>
    %79 = arith.addf %78, %77 : vector<8x128xf32>
    %80 = arith.divf %78, %79 : vector<8x128xf32>
    %81 = vector.extract_strided_slice %74 {offsets = [0, 128], sizes = [8, 128], strides = [1, 1]} : vector<8x512xf32> to vector<8x128xf32>
    %82 = arith.negf %81 : vector<8x128xf32>
    %83 = math.exp %82 : vector<8x128xf32>
    %cst_22 = arith.constant 1.000000e+00 : f32
    %84 = vector.broadcast %cst_22 : f32 to vector<8x128xf32>
    %85 = arith.addf %84, %83 : vector<8x128xf32>
    %86 = arith.divf %84, %85 : vector<8x128xf32>
    %87 = vector.extract_strided_slice %74 {offsets = [0, 256], sizes = [8, 128], strides = [1, 1]} : vector<8x512xf32> to vector<8x128xf32>
    %88 = math.tanh %87 : vector<8x128xf32>
    %89 = vector.extract_strided_slice %74 {offsets = [0, 384], sizes = [8, 128], strides = [1, 1]} : vector<8x512xf32> to vector<8x128xf32>
    %90 = arith.negf %89 : vector<8x128xf32>
    %91 = math.exp %90 : vector<8x128xf32>
    %cst_23 = arith.constant 1.000000e+00 : f32
    %92 = vector.broadcast %cst_23 : f32 to vector<8x128xf32>
    %93 = arith.addf %92, %91 : vector<8x128xf32>
    %94 = arith.divf %92, %93 : vector<8x128xf32>
    %95 = arith.mulf %86, %66 : vector<8x128xf32>
    %96 = arith.mulf %80, %88 : vector<8x128xf32>
    %97 = arith.addf %95, %96 : vector<8x128xf32>
    %98 = math.tanh %97 : vector<8x128xf32>
    %99 = arith.mulf %94, %98 : vector<8x128xf32>
    %100 = arith.truncf %99 : vector<8x128xf32> to vector<8x128xbf16>
    %c0_24 = arith.constant 0 : index
    %c256 = arith.constant 256 : index
    %101 = vector.load %arg9[%c0_24, %c256] : memref<8x1280xbf16, #tpu.memory_space<vmem>>, vector<8x128xbf16>
    tpu.vector_store %arg9[%c0_24, %c256], %100 {strides = array<i32>} : memref<8x1280xbf16, #tpu.memory_space<vmem>>, vector<8x128xbf16>,
    %102 = vector.extract_strided_slice %5 {offsets = [24, 0], sizes = [8, 512], strides = [1, 1]} : vector<80x512xf32> to vector<8x512xf32>
    %103 = arith.truncf %99 : vector<8x128xf32> to vector<8x128xbf16>
    %cst_25 = arith.constant dense<0.000000e+00> : vector<8x512xf32>
    %104 = tpu.matmul %103, %6, %cst_25 {dimension_numbers = #tpu.dot_dimension_numbers<[1], [0], [0], [1], [0, 0, 1, 1], [], []>} : vector<8x128xbf16>, vector<128x512xbf16>, vector<8x512xf32> -> vector<8x512xf32>
    %105 = arith.addf %102, %104 : vector<8x512xf32>
    %106 = vector.extract_strided_slice %105 {offsets = [0, 0], sizes = [8, 128], strides = [1, 1]} : vector<8x512xf32> to vector<8x128xf32>
    %107 = arith.negf %106 : vector<8x128xf32>
    %108 = math.exp %107 : vector<8x128xf32>
    %cst_26 = arith.constant 1.000000e+00 : f32
    %109 = vector.broadcast %cst_26 : f32 to vector<8x128xf32>
    %110 = arith.addf %109, %108 : vector<8x128xf32>
    %111 = arith.divf %109, %110 : vector<8x128xf32>
    %112 = vector.extract_strided_slice %105 {offsets = [0, 128], sizes = [8, 128], strides = [1, 1]} : vector<8x512xf32> to vector<8x128xf32>
    %113 = arith.negf %112 : vector<8x128xf32>
    %114 = math.exp %113 : vector<8x128xf32>
    %cst_27 = arith.constant 1.000000e+00 : f32
    %115 = vector.broadcast %cst_27 : f32 to vector<8x128xf32>
    %116 = arith.addf %115, %114 : vector<8x128xf32>
    %117 = arith.divf %115, %116 : vector<8x128xf32>
    %118 = vector.extract_strided_slice %105 {offsets = [0, 256], sizes = [8, 128], strides = [1, 1]} : vector<8x512xf32> to vector<8x128xf32>
    %119 = math.tanh %118 : vector<8x128xf32>
    %120 = vector.extract_strided_slice %105 {offsets = [0, 384], sizes = [8, 128], strides = [1, 1]} : vector<8x512xf32> to vector<8x128xf32>
    %121 = arith.negf %120 : vector<8x128xf32>
    %122 = math.exp %121 : vector<8x128xf32>
    %cst_28 = arith.constant 1.000000e+00 : f32
    %123 = vector.broadcast %cst_28 : f32 to vector<8x128xf32>
    %124 = arith.addf %123, %122 : vector<8x128xf32>
    %125 = arith.divf %123, %124 : vector<8x128xf32>
    %126 = arith.mulf %117, %97 : vector<8x128xf32>
    %127 = arith.mulf %111, %119 : vector<8x128xf32>
    %128 = arith.addf %126, %127 : vector<8x128xf32>
    %129 = math.tanh %128 : vector<8x128xf32>
    %130 = arith.mulf %125, %129 : vector<8x128xf32>
    %131 = arith.truncf %130 : vector<8x128xf32> to vector<8x128xbf16>
    %c0_29 = arith.constant 0 : index
    %c384 = arith.constant 384 : index
    %132 = vector.load %arg9[%c0_29, %c384] : memref<8x1280xbf16, #tpu.memory_space<vmem>>, vector<8x128xbf16>
    tpu.vector_store %arg9[%c0_29, %c384], %131 {strides = array<i32>} : memref<8x1280xbf16, #tpu.memory_space<vmem>>, vector<8x128xbf16>,
    %133 = vector.extract_strided_slice %5 {offsets = [32, 0], sizes = [8, 512], strides = [1, 1]} : vector<80x512xf32> to vector<8x512xf32>
    %134 = arith.truncf %130 : vector<8x128xf32> to vector<8x128xbf16>
    %cst_30 = arith.constant dense<0.000000e+00> : vector<8x512xf32>
    %135 = tpu.matmul %134, %6, %cst_30 {dimension_numbers = #tpu.dot_dimension_numbers<[1], [0], [0], [1], [0, 0, 1, 1], [], []>} : vector<8x128xbf16>, vector<128x512xbf16>, vector<8x512xf32> -> vector<8x512xf32>
    %136 = arith.addf %133, %135 : vector<8x512xf32>
    %137 = vector.extract_strided_slice %136 {offsets = [0, 0], sizes = [8, 128], strides = [1, 1]} : vector<8x512xf32> to vector<8x128xf32>
    %138 = arith.negf %137 : vector<8x128xf32>
    %139 = math.exp %138 : vector<8x128xf32>
    %cst_31 = arith.constant 1.000000e+00 : f32
    %140 = vector.broadcast %cst_31 : f32 to vector<8x128xf32>
    %141 = arith.addf %140, %139 : vector<8x128xf32>
    %142 = arith.divf %140, %141 : vector<8x128xf32>
    %143 = vector.extract_strided_slice %136 {offsets = [0, 128], sizes = [8, 128], strides = [1, 1]} : vector<8x512xf32> to vector<8x128xf32>
    %144 = arith.negf %143 : vector<8x128xf32>
    %145 = math.exp %144 : vector<8x128xf32>
    %cst_32 = arith.constant 1.000000e+00 : f32
    %146 = vector.broadcast %cst_32 : f32 to vector<8x128xf32>
    %147 = arith.addf %146, %145 : vector<8x128xf32>
    %148 = arith.divf %146, %147 : vector<8x128xf32>
    %149 = vector.extract_strided_slice %136 {offsets = [0, 256], sizes = [8, 128], strides = [1, 1]} : vector<8x512xf32> to vector<8x128xf32>
    %150 = math.tanh %149 : vector<8x128xf32>
    %151 = vector.extract_strided_slice %136 {offsets = [0, 384], sizes = [8, 128], strides = [1, 1]} : vector<8x512xf32> to vector<8x128xf32>
    %152 = arith.negf %151 : vector<8x128xf32>
    %153 = math.exp %152 : vector<8x128xf32>
    %cst_33 = arith.constant 1.000000e+00 : f32
    %154 = vector.broadcast %cst_33 : f32 to vector<8x128xf32>
    %155 = arith.addf %154, %153 : vector<8x128xf32>
    %156 = arith.divf %154, %155 : vector<8x128xf32>
    %157 = arith.mulf %148, %128 : vector<8x128xf32>
    %158 = arith.mulf %142, %150 : vector<8x128xf32>
    %159 = arith.addf %157, %158 : vector<8x128xf32>
    %160 = math.tanh %159 : vector<8x128xf32>
    %161 = arith.mulf %156, %160 : vector<8x128xf32>
    %162 = arith.truncf %161 : vector<8x128xf32> to vector<8x128xbf16>
    %c0_34 = arith.constant 0 : index
    %c512 = arith.constant 512 : index
    %163 = vector.load %arg9[%c0_34, %c512] : memref<8x1280xbf16, #tpu.memory_space<vmem>>, vector<8x128xbf16>
    tpu.vector_store %arg9[%c0_34, %c512], %162 {strides = array<i32>} : memref<8x1280xbf16, #tpu.memory_space<vmem>>, vector<8x128xbf16>,
    %164 = vector.extract_strided_slice %5 {offsets = [40, 0], sizes = [8, 512], strides = [1, 1]} : vector<80x512xf32> to vector<8x512xf32>
    %165 = arith.truncf %161 : vector<8x128xf32> to vector<8x128xbf16>
    %cst_35 = arith.constant dense<0.000000e+00> : vector<8x512xf32>
    %166 = tpu.matmul %165, %6, %cst_35 {dimension_numbers = #tpu.dot_dimension_numbers<[1], [0], [0], [1], [0, 0, 1, 1], [], []>} : vector<8x128xbf16>, vector<128x512xbf16>, vector<8x512xf32> -> vector<8x512xf32>
    %167 = arith.addf %164, %166 : vector<8x512xf32>
    %168 = vector.extract_strided_slice %167 {offsets = [0, 0], sizes = [8, 128], strides = [1, 1]} : vector<8x512xf32> to vector<8x128xf32>
    %169 = arith.negf %168 : vector<8x128xf32>
    %170 = math.exp %169 : vector<8x128xf32>
    %cst_36 = arith.constant 1.000000e+00 : f32
    %171 = vector.broadcast %cst_36 : f32 to vector<8x128xf32>
    %172 = arith.addf %171, %170 : vector<8x128xf32>
    %173 = arith.divf %171, %172 : vector<8x128xf32>
    %174 = vector.extract_strided_slice %167 {offsets = [0, 128], sizes = [8, 128], strides = [1, 1]} : vector<8x512xf32> to vector<8x128xf32>
    %175 = arith.negf %174 : vector<8x128xf32>
    %176 = math.exp %175 : vector<8x128xf32>
    %cst_37 = arith.constant 1.000000e+00 : f32
    %177 = vector.broadcast %cst_37 : f32 to vector<8x128xf32>
    %178 = arith.addf %177, %176 : vector<8x128xf32>
    %179 = arith.divf %177, %178 : vector<8x128xf32>
    %180 = vector.extract_strided_slice %167 {offsets = [0, 256], sizes = [8, 128], strides = [1, 1]} : vector<8x512xf32> to vector<8x128xf32>
    %181 = math.tanh %180 : vector<8x128xf32>
    %182 = vector.extract_strided_slice %167 {offsets = [0, 384], sizes = [8, 128], strides = [1, 1]} : vector<8x512xf32> to vector<8x128xf32>
    %183 = arith.negf %182 : vector<8x128xf32>
    %184 = math.exp %183 : vector<8x128xf32>
    %cst_38 = arith.constant 1.000000e+00 : f32
    %185 = vector.broadcast %cst_38 : f32 to vector<8x128xf32>
    %186 = arith.addf %185, %184 : vector<8x128xf32>
    %187 = arith.divf %185, %186 : vector<8x128xf32>
    %188 = arith.mulf %179, %159 : vector<8x128xf32>
    %189 = arith.mulf %173, %181 : vector<8x128xf32>
    %190 = arith.addf %188, %189 : vector<8x128xf32>
    %191 = math.tanh %190 : vector<8x128xf32>
    %192 = arith.mulf %187, %191 : vector<8x128xf32>
    %193 = arith.truncf %192 : vector<8x128xf32> to vector<8x128xbf16>
    %c0_39 = arith.constant 0 : index
    %c640 = arith.constant 640 : index
    %194 = vector.load %arg9[%c0_39, %c640] : memref<8x1280xbf16, #tpu.memory_space<vmem>>, vector<8x128xbf16>
    tpu.vector_store %arg9[%c0_39, %c640], %193 {strides = array<i32>} : memref<8x1280xbf16, #tpu.memory_space<vmem>>, vector<8x128xbf16>,
    %195 = vector.extract_strided_slice %5 {offsets = [48, 0], sizes = [8, 512], strides = [1, 1]} : vector<80x512xf32> to vector<8x512xf32>
    %196 = arith.truncf %192 : vector<8x128xf32> to vector<8x128xbf16>
    %cst_40 = arith.constant dense<0.000000e+00> : vector<8x512xf32>
    %197 = tpu.matmul %196, %6, %cst_40 {dimension_numbers = #tpu.dot_dimension_numbers<[1], [0], [0], [1], [0, 0, 1, 1], [], []>} : vector<8x128xbf16>, vector<128x512xbf16>, vector<8x512xf32> -> vector<8x512xf32>
    %198 = arith.addf %195, %197 : vector<8x512xf32>
    %199 = vector.extract_strided_slice %198 {offsets = [0, 0], sizes = [8, 128], strides = [1, 1]} : vector<8x512xf32> to vector<8x128xf32>
    %200 = arith.negf %199 : vector<8x128xf32>
    %201 = math.exp %200 : vector<8x128xf32>
    %cst_41 = arith.constant 1.000000e+00 : f32
    %202 = vector.broadcast %cst_41 : f32 to vector<8x128xf32>
    %203 = arith.addf %202, %201 : vector<8x128xf32>
    %204 = arith.divf %202, %203 : vector<8x128xf32>
    %205 = vector.extract_strided_slice %198 {offsets = [0, 128], sizes = [8, 128], strides = [1, 1]} : vector<8x512xf32> to vector<8x128xf32>
    %206 = arith.negf %205 : vector<8x128xf32>
    %207 = math.exp %206 : vector<8x128xf32>
    %cst_42 = arith.constant 1.000000e+00 : f32
    %208 = vector.broadcast %cst_42 : f32 to vector<8x128xf32>
    %209 = arith.addf %208, %207 : vector<8x128xf32>
    %210 = arith.divf %208, %209 : vector<8x128xf32>
    %211 = vector.extract_strided_slice %198 {offsets = [0, 256], sizes = [8, 128], strides = [1, 1]} : vector<8x512xf32> to vector<8x128xf32>
    %212 = math.tanh %211 : vector<8x128xf32>
    %213 = vector.extract_strided_slice %198 {offsets = [0, 384], sizes = [8, 128], strides = [1, 1]} : vector<8x512xf32> to vector<8x128xf32>
    %214 = arith.negf %213 : vector<8x128xf32>
    %215 = math.exp %214 : vector<8x128xf32>
    %cst_43 = arith.constant 1.000000e+00 : f32
    %216 = vector.broadcast %cst_43 : f32 to vector<8x128xf32>
    %217 = arith.addf %216, %215 : vector<8x128xf32>
    %218 = arith.divf %216, %217 : vector<8x128xf32>
    %219 = arith.mulf %210, %190 : vector<8x128xf32>
    %220 = arith.mulf %204, %212 : vector<8x128xf32>
    %221 = arith.addf %219, %220 : vector<8x128xf32>
    %222 = math.tanh %221 : vector<8x128xf32>
    %223 = arith.mulf %218, %222 : vector<8x128xf32>
    %224 = arith.truncf %223 : vector<8x128xf32> to vector<8x128xbf16>
    %c0_44 = arith.constant 0 : index
    %c768 = arith.constant 768 : index
    %225 = vector.load %arg9[%c0_44, %c768] : memref<8x1280xbf16, #tpu.memory_space<vmem>>, vector<8x128xbf16>
    tpu.vector_store %arg9[%c0_44, %c768], %224 {strides = array<i32>} : memref<8x1280xbf16, #tpu.memory_space<vmem>>, vector<8x128xbf16>,
    %226 = vector.extract_strided_slice %5 {offsets = [56, 0], sizes = [8, 512], strides = [1, 1]} : vector<80x512xf32> to vector<8x512xf32>
    %227 = arith.truncf %223 : vector<8x128xf32> to vector<8x128xbf16>
    %cst_45 = arith.constant dense<0.000000e+00> : vector<8x512xf32>
    %228 = tpu.matmul %227, %6, %cst_45 {dimension_numbers = #tpu.dot_dimension_numbers<[1], [0], [0], [1], [0, 0, 1, 1], [], []>} : vector<8x128xbf16>, vector<128x512xbf16>, vector<8x512xf32> -> vector<8x512xf32>
    %229 = arith.addf %226, %228 : vector<8x512xf32>
    %230 = vector.extract_strided_slice %229 {offsets = [0, 0], sizes = [8, 128], strides = [1, 1]} : vector<8x512xf32> to vector<8x128xf32>
    %231 = arith.negf %230 : vector<8x128xf32>
    %232 = math.exp %231 : vector<8x128xf32>
    %cst_46 = arith.constant 1.000000e+00 : f32
    %233 = vector.broadcast %cst_46 : f32 to vector<8x128xf32>
    %234 = arith.addf %233, %232 : vector<8x128xf32>
    %235 = arith.divf %233, %234 : vector<8x128xf32>
    %236 = vector.extract_strided_slice %229 {offsets = [0, 128], sizes = [8, 128], strides = [1, 1]} : vector<8x512xf32> to vector<8x128xf32>
    %237 = arith.negf %236 : vector<8x128xf32>
    %238 = math.exp %237 : vector<8x128xf32>
    %cst_47 = arith.constant 1.000000e+00 : f32
    %239 = vector.broadcast %cst_47 : f32 to vector<8x128xf32>
    %240 = arith.addf %239, %238 : vector<8x128xf32>
    %241 = arith.divf %239, %240 : vector<8x128xf32>
    %242 = vector.extract_strided_slice %229 {offsets = [0, 256], sizes = [8, 128], strides = [1, 1]} : vector<8x512xf32> to vector<8x128xf32>
    %243 = math.tanh %242 : vector<8x128xf32>
    %244 = vector.extract_strided_slice %229 {offsets = [0, 384], sizes = [8, 128], strides = [1, 1]} : vector<8x512xf32> to vector<8x128xf32>
    %245 = arith.negf %244 : vector<8x128xf32>
    %246 = math.exp %245 : vector<8x128xf32>
    %cst_48 = arith.constant 1.000000e+00 : f32
    %247 = vector.broadcast %cst_48 : f32 to vector<8x128xf32>
    %248 = arith.addf %247, %246 : vector<8x128xf32>
    %249 = arith.divf %247, %248 : vector<8x128xf32>
    %250 = arith.mulf %241, %221 : vector<8x128xf32>
    %251 = arith.mulf %235, %243 : vector<8x128xf32>
    %252 = arith.addf %250, %251 : vector<8x128xf32>
    %253 = math.tanh %252 : vector<8x128xf32>
    %254 = arith.mulf %249, %253 : vector<8x128xf32>
    %255 = arith.truncf %254 : vector<8x128xf32> to vector<8x128xbf16>
    %c0_49 = arith.constant 0 : index
    %c896 = arith.constant 896 : index
    %256 = vector.load %arg9[%c0_49, %c896] : memref<8x1280xbf16, #tpu.memory_space<vmem>>, vector<8x128xbf16>
    tpu.vector_store %arg9[%c0_49, %c896], %255 {strides = array<i32>} : memref<8x1280xbf16, #tpu.memory_space<vmem>>, vector<8x128xbf16>,
    %257 = vector.extract_strided_slice %5 {offsets = [64, 0], sizes = [8, 512], strides = [1, 1]} : vector<80x512xf32> to vector<8x512xf32>
    %258 = arith.truncf %254 : vector<8x128xf32> to vector<8x128xbf16>
    %cst_50 = arith.constant dense<0.000000e+00> : vector<8x512xf32>
    %259 = tpu.matmul %258, %6, %cst_50 {dimension_numbers = #tpu.dot_dimension_numbers<[1], [0], [0], [1], [0, 0, 1, 1], [], []>} : vector<8x128xbf16>, vector<128x512xbf16>, vector<8x512xf32> -> vector<8x512xf32>
    %260 = arith.addf %257, %259 : vector<8x512xf32>
    %261 = vector.extract_strided_slice %260 {offsets = [0, 0], sizes = [8, 128], strides = [1, 1]} : vector<8x512xf32> to vector<8x128xf32>
    %262 = arith.negf %261 : vector<8x128xf32>
    %263 = math.exp %262 : vector<8x128xf32>
    %cst_51 = arith.constant 1.000000e+00 : f32
    %264 = vector.broadcast %cst_51 : f32 to vector<8x128xf32>
    %265 = arith.addf %264, %263 : vector<8x128xf32>
    %266 = arith.divf %264, %265 : vector<8x128xf32>
    %267 = vector.extract_strided_slice %260 {offsets = [0, 128], sizes = [8, 128], strides = [1, 1]} : vector<8x512xf32> to vector<8x128xf32>
    %268 = arith.negf %267 : vector<8x128xf32>
    %269 = math.exp %268 : vector<8x128xf32>
    %cst_52 = arith.constant 1.000000e+00 : f32
    %270 = vector.broadcast %cst_52 : f32 to vector<8x128xf32>
    %271 = arith.addf %270, %269 : vector<8x128xf32>
    %272 = arith.divf %270, %271 : vector<8x128xf32>
    %273 = vector.extract_strided_slice %260 {offsets = [0, 256], sizes = [8, 128], strides = [1, 1]} : vector<8x512xf32> to vector<8x128xf32>
    %274 = math.tanh %273 : vector<8x128xf32>
    %275 = vector.extract_strided_slice %260 {offsets = [0, 384], sizes = [8, 128], strides = [1, 1]} : vector<8x512xf32> to vector<8x128xf32>
    %276 = arith.negf %275 : vector<8x128xf32>
    %277 = math.exp %276 : vector<8x128xf32>
    %cst_53 = arith.constant 1.000000e+00 : f32
    %278 = vector.broadcast %cst_53 : f32 to vector<8x128xf32>
    %279 = arith.addf %278, %277 : vector<8x128xf32>
    %280 = arith.divf %278, %279 : vector<8x128xf32>
    %281 = arith.mulf %272, %252 : vector<8x128xf32>
    %282 = arith.mulf %266, %274 : vector<8x128xf32>
    %283 = arith.addf %281, %282 : vector<8x128xf32>
    %284 = math.tanh %283 : vector<8x128xf32>
    %285 = arith.mulf %280, %284 : vector<8x128xf32>
    %286 = arith.truncf %285 : vector<8x128xf32> to vector<8x128xbf16>
    %c0_54 = arith.constant 0 : index
    %c1024 = arith.constant 1024 : index
    %287 = vector.load %arg9[%c0_54, %c1024] : memref<8x1280xbf16, #tpu.memory_space<vmem>>, vector<8x128xbf16>
    tpu.vector_store %arg9[%c0_54, %c1024], %286 {strides = array<i32>} : memref<8x1280xbf16, #tpu.memory_space<vmem>>, vector<8x128xbf16>,
    %288 = vector.extract_strided_slice %5 {offsets = [72, 0], sizes = [8, 512], strides = [1, 1]} : vector<80x512xf32> to vector<8x512xf32>
    %289 = arith.truncf %285 : vector<8x128xf32> to vector<8x128xbf16>
    %cst_55 = arith.constant dense<0.000000e+00> : vector<8x512xf32>
    %290 = tpu.matmul %289, %6, %cst_55 {dimension_numbers = #tpu.dot_dimension_numbers<[1], [0], [0], [1], [0, 0, 1, 1], [], []>} : vector<8x128xbf16>, vector<128x512xbf16>, vector<8x512xf32> -> vector<8x512xf32>
    %291 = arith.addf %288, %290 : vector<8x512xf32>
    %292 = vector.extract_strided_slice %291 {offsets = [0, 0], sizes = [8, 128], strides = [1, 1]} : vector<8x512xf32> to vector<8x128xf32>
    %293 = arith.negf %292 : vector<8x128xf32>
    %294 = math.exp %293 : vector<8x128xf32>
    %cst_56 = arith.constant 1.000000e+00 : f32
    %295 = vector.broadcast %cst_56 : f32 to vector<8x128xf32>
    %296 = arith.addf %295, %294 : vector<8x128xf32>
    %297 = arith.divf %295, %296 : vector<8x128xf32>
    %298 = vector.extract_strided_slice %291 {offsets = [0, 128], sizes = [8, 128], strides = [1, 1]} : vector<8x512xf32> to vector<8x128xf32>
    %299 = arith.negf %298 : vector<8x128xf32>
    %300 = math.exp %299 : vector<8x128xf32>
    %cst_57 = arith.constant 1.000000e+00 : f32
    %301 = vector.broadcast %cst_57 : f32 to vector<8x128xf32>
    %302 = arith.addf %301, %300 : vector<8x128xf32>
    %303 = arith.divf %301, %302 : vector<8x128xf32>
    %304 = vector.extract_strided_slice %291 {offsets = [0, 256], sizes = [8, 128], strides = [1, 1]} : vector<8x512xf32> to vector<8x128xf32>
    %305 = math.tanh %304 : vector<8x128xf32>
    %306 = vector.extract_strided_slice %291 {offsets = [0, 384], sizes = [8, 128], strides = [1, 1]} : vector<8x512xf32> to vector<8x128xf32>
    %307 = arith.negf %306 : vector<8x128xf32>
    %308 = math.exp %307 : vector<8x128xf32>
    %cst_58 = arith.constant 1.000000e+00 : f32
    %309 = vector.broadcast %cst_58 : f32 to vector<8x128xf32>
    %310 = arith.addf %309, %308 : vector<8x128xf32>
    %311 = arith.divf %309, %310 : vector<8x128xf32>
    %312 = arith.mulf %303, %283 : vector<8x128xf32>
    %313 = arith.mulf %297, %305 : vector<8x128xf32>
    %314 = arith.addf %312, %313 : vector<8x128xf32>
    %315 = math.tanh %314 : vector<8x128xf32>
    %316 = arith.mulf %311, %315 : vector<8x128xf32>
    %317 = arith.truncf %316 : vector<8x128xf32> to vector<8x128xbf16>
    %c0_59 = arith.constant 0 : index
    %c1152 = arith.constant 1152 : index
    %318 = vector.load %arg9[%c0_59, %c1152] : memref<8x1280xbf16, #tpu.memory_space<vmem>>, vector<8x128xbf16>
    tpu.vector_store %arg9[%c0_59, %c1152], %317 {strides = array<i32>} : memref<8x1280xbf16, #tpu.memory_space<vmem>>, vector<8x128xbf16>,
    %c0_60 = arith.constant 0 : index
    %c0_61 = arith.constant 0 : index
    %319 = vector.load %arg9[%c0_60, %c0_61] : memref<8x1280xbf16, #tpu.memory_space<vmem>>, vector<8x1280xbf16>
    %c0_62 = arith.constant 0 : index
    %c0_63 = arith.constant 0 : index
    %320 = vector.load %arg4[%c0_62, %c0_63] : memref<1280x256xbf16, #tpu.memory_space<vmem>>, vector<1280x256xbf16>
    %cst_64 = arith.constant dense<0.000000e+00> : vector<8x256xf32>
    %321 = tpu.matmul %319, %320, %cst_64 {dimension_numbers = #tpu.dot_dimension_numbers<[1], [0], [0], [1], [0, 0, 1, 1], [], []>} : vector<8x1280xbf16>, vector<1280x256xbf16>, vector<8x256xf32> -> vector<8x256xf32>
    %c0_65 = arith.constant 0 : index
    %c0_66 = arith.constant 0 : index
    %322 = vector.load %arg5[%c0_65, %c0_66] : memref<1x256xf32, #tpu.memory_space<vmem>>, vector<1x256xf32>
    %323 = vector.broadcast %322 : vector<1x256xf32> to vector<8x256xf32>
    %324 = arith.addf %321, %323 : vector<8x256xf32>
    %325 = arith.truncf %324 : vector<8x256xf32> to vector<8x256xbf16>
    %c0_67 = arith.constant 0 : index
    %c0_68 = arith.constant 0 : index
    %326 = vector.load %arg6[%c0_67, %c0_68] : memref<256x128xbf16, #tpu.memory_space<vmem>>, vector<256x128xbf16>
    %cst_69 = arith.constant dense<0.000000e+00> : vector<8x128xf32>
    %327 = tpu.matmul %325, %326, %cst_69 {dimension_numbers = #tpu.dot_dimension_numbers<[1], [0], [0], [1], [0, 0, 1, 1], [], []>} : vector<8x256xbf16>, vector<256x128xbf16>, vector<8x128xf32> -> vector<8x128xf32>
    %c0_70 = arith.constant 0 : index
    %c0_71 = arith.constant 0 : index
    %328 = vector.load %arg7[%c0_70, %c0_71] : memref<1x128xf32, #tpu.memory_space<vmem>>, vector<1x128xf32>
    %329 = vector.broadcast %328 : vector<1x128xf32> to vector<8x128xf32>
    %330 = arith.addf %327, %329 : vector<8x128xf32>
    %c0_72 = arith.constant 0 : index
    %c0_73 = arith.constant 0 : index
    %331 = vector.load %arg8[%c0_72, %c0_73] : memref<8x128xf32, #tpu.memory_space<vmem>>, vector<8x128xf32>
    tpu.vector_store %arg8[%c0_72, %c0_73], %330 {strides = array<i32>} : memref<8x128xf32, #tpu.memory_space<vmem>>, vector<8x128xf32>,
    return
  }
}

</mosaic_0001>

<bundles_post_ra>
// kernel: lstm_regressor_forward.1
= control target key start
LH: loop header
LB: loop body
LE: loop exit
PB: predicated region body
PF: predicated region fallthrough
CT: control target
= control target key end

     0   :  { %13 = vsyncpa [#allocation4], 0  ;;  %s4818_s0 = inlined_call_operand.vmem [shape: bf16[80,16], index: 0, kind: input, shape index: {}]   ;;  %s4819_s1 = inlined_call_operand.vmem [shape: bf16[16,512], index: 1, kind: input, shape index: {}]   ;;  %s4820_s2 = inlined_call_operand.hbm [shape: bf16[128,512], index: 2, kind: input, shape index: {}]   ;;  %s4821_s3 = inlined_call_operand.vmem [shape: f32[1,512], index: 3, kind: input, shape index: {}]   ;;  %s4822_s4 = inlined_call_operand.hbm [shape: bf16[1280,256], index: 4, kind: input, shape index: {}]   ;;  %s4823_s5 = inlined_call_operand.vmem [shape: f32[1,256], index: 5, kind: input, shape index: {}]   ;;  %s4824_s6 = inlined_call_operand.hbm [shape: bf16[256,128], index: 6, kind: input, shape index: {}]   ;;  %s4825_s7 = inlined_call_operand.vmem [shape: f32[1,128], index: 7, kind: input, shape index: {}]   ;;  %s4826_s8 = inlined_call_operand.vmem [shape: f32[8,128], index: 8, kind: output, shape index: {}]  }
   0x1   :  { %14 = vsyncpa [#allocation6], 0  ;;  %s3952_s27 = smov [#allocation5]   ;;  %s3882_s9 = scalar_lea.hbm %s4822_s4, 20480 }
   0x2   :  { %s38_s28 = sshll.u32 %s3952_s27, 4  ;;  %p3883_p0 = scmp.ne.s32.totalorder %s4822_s4, %s3882_s9  ;;  %s39_s28 = int_to_ptr.vmem [resolvable:$true] %s38_s28 }
   0x3   :  { %p3886_p1 = scmp.lt.u32.totalorder %s3882_s9, %s4822_s4 }
   0x5   :  { %p3888_p2 = pnand %p3886_p1, %p3883_p0 }
   0x7   :  { %3891 = shalt.err (!%p3888_p2)
}
   0x8   :  { %s3892_s14 = scalar_lea.vmem %s39_s28, 20480  ;;  %p3897_p4 = scmp.lt.s32.totalorder %s39_s28, %s39_s28 }
   0x9   :  { %p3893_p3 = scmp.ne.s32.totalorder %s39_s28, %s3892_s14  ;;  %p3898_p5 = scmp.lt.s32.totalorder %s3892_s14, %s3892_s14 }
   0xb   :  { %p3899_p6 = por %p3898_p5, %p3897_p4 }
   0xd   :  { %p3900_p7 = pnand %p3899_p6, %p3893_p3 }
   0xf   :  { %3903 = shalt.err (!%p3900_p7)
}
  0x10   :  { %s3953_s15 = smov 128   ;;  %s3954_s16 = smov 8  }
  0x11   :  { %44 = dma.hbm_to_vmem [thread:$0]  %s4822_s4, 20480, %s39_s28, [#allocation6], %s3953_s15, %s3953_s15, %s3954_s16  }
  0x12   :  { %s3955_s19 = smov [#allocation3]   ;;  %s3904_s23 = scalar_lea.hbm %s4820_s2, 4096 }
  0x13   :  { %s24_s20 = sshll.u32 %s3955_s19, 4  ;;  %p3905_p8 = scmp.ne.s32.totalorder %s4820_s2, %s3904_s23  ;;  %s25_s20 = int_to_ptr.vmem [resolvable:$true] %s24_s20 }
  0x14   :  { %p3908_p9 = scmp.lt.u32.totalorder %s3904_s23, %s4820_s2 }
  0x16   :  { %p3910_p10 = pnand %p3908_p9, %p3905_p8 }
  0x18   :  { %3913 = shalt.err (!%p3910_p10)
}
  0x19   :  { %s3914_s29 = scalar_lea.vmem %s25_s20, 4096  ;;  %p3919_p12 = scmp.lt.s32.totalorder %s25_s20, %s25_s20 }
  0x1a   :  { %p3915_p11 = scmp.ne.s32.totalorder %s25_s20, %s3914_s29  ;;  %p3920_p13 = scmp.lt.s32.totalorder %s3914_s29, %s3914_s29 }
  0x1c   :  { %p3921_p0 = por %p3920_p13, %p3919_p12 }
  0x1e   :  { %p3922_p1 = pnand %p3921_p0, %p3915_p11 }
  0x20   :  { %3925 = shalt.err (!%p3922_p1)
}
  0x21   :  { %s3956_s4 = smov 256   ;;  %s3957_s28 = smov 16  }
  0x22   :  { %30 = dma.hbm_to_vmem [thread:$0]  %s4820_s2, 4096, %s25_s20, [#allocation4], %s3956_s4, %s3956_s4, %s3957_s28  }
  0x23   :  { %s3958_s10 = smov [#allocation7]   ;;  %s3926_s14 = scalar_lea.hbm %s4824_s6, 2048 }
  0x24   :  { %s52_s11 = sshll.u32 %s3958_s10, 4  ;;  %p3927_p2 = scmp.ne.s32.totalorder %s4824_s6, %s3926_s14  ;;  %s53_s11 = int_to_ptr.vmem [resolvable:$true] %s52_s11 }
  0x25   :  { %p3930_p3 = scmp.lt.u32.totalorder %s3926_s14, %s4824_s6 }
  0x27   :  { %p3932_p4 = pnand %p3930_p3, %p3927_p2 }
  0x29   :  { %3935 = shalt.err (!%p3932_p4)
}
  0x2a   :  { %s3936_s19 = scalar_lea.vmem %s53_s11, 2048  ;;  %p3941_p6 = scmp.lt.s32.totalorder %s53_s11, %s53_s11 }
  0x2b   :  { %p3937_p5 = scmp.ne.s32.totalorder %s53_s11, %s3936_s19  ;;  %p3942_p7 = scmp.lt.s32.totalorder %s3936_s19, %s3936_s19 }
  0x2d   :  { %p3943_p8 = por %p3942_p7, %p3941_p6 }
  0x2f   :  { %p3944_p9 = pnand %p3943_p8, %p3937_p5 }
  0x31   :  { %3947 = shalt.err (!%p3944_p9)
}
  0x32   :  { %s3959_s2 = smov 64   ;;  %s3960_s20 = smov 4  }
  0x33   :  { %58 = dma.hbm_to_vmem [thread:$0]  %s4824_s6, 2048, %s53_s11, [#allocation6], %s3959_s2, %s3959_s2, %s3960_s20  }
  0x34   :  { %3948 = dma.done.wait [#allocation4], 4096  }
  0x35   :  { %3949 = vsyncadd [#allocation4], 4294963200 }
  0x36   :  { %3950 = dma.done.wait [#allocation6], 22528  }
  0x37   :  { %3951 = vsyncadd [#allocation6], 4294944768  ;;  %v4829_v0 = vmov 0   ;;  %v3365_v1 = vld [vmem:[%s4819_s1 + $0x4] ss:$16 sps:$4 sm:$0xff]   ;;  %vm152_vm0 = vcmask 130048   ;;  %v87_v42 = vlaneseq }
  0x38   :  { %200 = vmatprep.mubr.bf16.mxu0 %v4829_v0  ;;  %240 = vmatprep.mubr.bf16.mxu1 %v4829_v0  ;;  %v3367_v2 = vld [vmem:[%s4819_s1] ss:$16 sps:$4 sm:$0xff]   ;;  %v3370_v5 = vld [vmem:[%s4819_s1 + $0x8] ss:$16 sps:$4 sm:$0xff]   ;;  %v3372_v6 = vld [vmem:[%s4819_s1 + $0xc] ss:$16 sps:$4 sm:$0xff]  }
  0x39   :  { %168 = vmatprep.subr.bf16.mxu0 %v3365_v1  ;;  %3337 = vmatprep.subr.bf16.mxu1 %v3365_v1  ;;  %v3368_v3 = vld [vmem:[%s4818_s0] sm:$0xff]   ;;  %v4065_v7 = vld [vmem:[#allocation3 + $0x4] ss:$16 sps:$4 sm:$0xff]   ;;  %v4067_v8 = vld [vmem:[#allocation3] ss:$16 sps:$4 sm:$0xff]   ;;  %v4230_v43 = vshrl.u32 %v87_v42, 7 }
  0x3a   :  { %169 = vmatpush1.bf16.msra.mxu0 %v3367_v2  ;;  %3338 = vmatpush1.bf16.msra.mxu1 %v3367_v2  ;;  %v4057_v4 = vld [vmem:[%s4818_s0 + $0x20] sm:$0xff]   ;;  %v4072_v9 = vld [vmem:[#allocation3 + $0x24] ss:$16 sps:$4 sm:$0xff]   ;;  %v4076_v10 = vld [vmem:[#allocation3 + $0x20] ss:$16 sps:$4 sm:$0xff]  }
  0x3b   :  { %251 = vmatprep.subr.bf16.mxu1 %v3372_v6  ;;  %526 = vmatprep.subr.bf16.mxu0 %v4065_v7  ;;  %v4080_v11 = vld [vmem:[#allocation3 + $0x44] ss:$16 sps:$4 sm:$0xff]   ;;  %v4086_v13 = vld [vmem:[#allocation3 + $0xc] ss:$16 sps:$4 sm:$0xff]   ;;  %v4088_v14 = vld [vmem:[#allocation3 + $0x8] ss:$16 sps:$4 sm:$0xff]  }
  0x3c   :  { %v3379_v12 = vld [vmem:[%s4818_s0 + $0x8] sm:$0xff]   ;;  %v4097_v17 = vld [vmem:[#allocation3 + $0x2c] ss:$16 sps:$4 sm:$0xff]   ;;  %v4104_v19 = vld [vmem:[#allocation3 + $0x28] ss:$16 sps:$4 sm:$0xff]   ;;  %4833 = vst [vmem:[#allocation10_spill] sm:$0xff] %v4230_v43 }
  0x3d   :  { %3056 = vmatmul.mubr.msk.bf16.vlgmr.msra.gmra.mrb[0].mxu0 %vm152_vm0, %v3368_v3  ;;  %3060 = vmatmul.mubr.msk.bf16.vlgmr.msra.gmra.mrb[0].mxu1 %vm152_vm0, %v4057_v4  ;;  %v4092_v15 = vld [vmem:[#allocation3 + $0x40] ss:$16 sps:$4 sm:$0xff]   ;;  %v4095_v16 = vld [vmem:[#allocation3 + $0x64] ss:$16 sps:$4 sm:$0xff]   ;;  %v4109_v20 = vld [vmem:[#allocation3 + $0x4c] ss:$16 sps:$4 sm:$0xff]  }
  0x3e   :  { %252 = vmatpush1.bf16.msra.mxu1 %v3370_v5  ;;  %527 = vmatpush1.bf16.msra.mxu0 %v4067_v8  ;;  %v4102_v18 = vld [vmem:[#allocation3 + $0x60] ss:$16 sps:$4 sm:$0xff]   ;;  %v4113_v21 = vld [vmem:[#allocation3 + $0x84] ss:$16 sps:$4 sm:$0xff]   ;;  %v3392_v22 = vld [vmem:[%s4818_s0 + $0x10] sm:$0xff]   ;;  %v4828_v44 = vsub.s32 0, %v4230_v43 }
  0x3f   :  { %528 = vmatprep.subr.bf16.mxu0 %v4072_v9  ;;  %210 = vmatprep.mubr.bf16.mxu0 %v4829_v0  ;;  %v4119_v23 = vld [vmem:[#allocation3 + $0x48] ss:$16 sps:$4 sm:$0xff]   ;;  %v4122_v24 = vld [vmem:[#allocation3 + $0x80] ss:$16 sps:$4 sm:$0xff]   ;;  %v4126_v25 = vld [vmem:[#allocation3 + $0xa4] ss:$16 sps:$4 sm:$0xff]  }
  0x40   :  { %283 = vmatprep.mubr.bf16.mxu1 %v4829_v0  ;;  %567 = vmatprep.subr.bf16.mxu1 %v4086_v13  ;;  %v4128_v26 = vld [vmem:[#allocation3 + $0x6c] ss:$16 sps:$4 sm:$0xff]   ;;  %v4134_v27 = vld [vmem:[#allocation3 + $0x68] ss:$16 sps:$4 sm:$0xff]   ;;  %v4137_v28 = vld [vmem:[#allocation3 + $0xa0] ss:$16 sps:$4 sm:$0xff]  }
  0x41   :  { %v4140_v29 = vld [vmem:[#allocation3 + $0x8c] ss:$16 sps:$4 sm:$0xff]   ;;  %v4144_v30 = vld [vmem:[#allocation3 + $0xc4] ss:$16 sps:$4 sm:$0xff]   ;;  %v4150_v32 = vld [vmem:[#allocation3 + $0xc0] ss:$16 sps:$4 sm:$0xff]  }
  0x42   :  { %529 = vmatpush1.bf16.msra.mxu0 %v4076_v10  ;;  %v3404_v31 = vld [vmem:[%s4818_s0 + $0x18] sm:$0xff]   ;;  %v4152_v33 = vld [vmem:[#allocation3 + $0x88] ss:$16 sps:$4 sm:$0xff]   ;;  %v4158_v35 = vld [vmem:[#allocation3 + $0xac] ss:$16 sps:$4 sm:$0xff]   ;;  %v4827_v46 = vsub.s32 1, %v4230_v43 }
  0x43   :  { %530 = vmatprep.subr.bf16.mxu0 %v4080_v11  ;;  %v4155_v34 = vld [vmem:[#allocation3 + $0xe4] ss:$16 sps:$4 sm:$0xff]   ;;  %v4161_v36 = vld [vmem:[#allocation3 + $0xa8] ss:$16 sps:$4 sm:$0xff]   ;;  %v4165_v37 = vld [vmem:[#allocation3 + $0xe0] ss:$16 sps:$4 sm:$0xff]  }
  0x44   :  { %v4167_v38 = vld [vmem:[#allocation3 + $0xcc] ss:$16 sps:$4 sm:$0xff]   ;;  %v4175_v39 = vld [vmem:[#allocation3 + $0xc8] ss:$16 sps:$4 sm:$0xff]   ;;  %v97_v63 = vsub.s32 2, %v4230_v43  ;;  %v101_v1 = vsub.s32 3, %v4230_v43 }
  0x45   :  { %3057 = vmatmul.mubr.msk.bf16.gmra.mrb[4].mxu0 %vm152_vm0, %v3379_v12  ;;  %3061 = vmatmul.mubr.msk.bf16.vlgmr.msra.gmra.mrb[4].mxu1 %vm152_vm0, %v3368_v3  ;;  %v4178_v40 = vld [vmem:[#allocation3 + $0xec] ss:$16 sps:$4 sm:$0xff]   ;;  %v4184_v41 = vld [vmem:[#allocation3 + $0xe8] ss:$16 sps:$4 sm:$0xff]  }
  0x46   :  { %568 = vmatpush1.bf16.msra.mxu1 %v4088_v14  ;;  %220 = vmatprep.mubr.bf16.mxu0 %v4829_v0  ;;  %v85_v45 = vld [vmem:[%s4821_s3] sm:$0xf] }
  0x47   :  { %531 = vmatpush1.bf16.msra.mxu0 %v4092_v15  ;;  %569 = vmatprep.subr.bf16.mxu1 %v4097_v17  ;;  %v4239_v47 = vrot.slane %v85_v45, %v4828_v44  ;;  %v4243_v48 = vrot.slane %v85_v45, %v4827_v46  ;;  %v4274_v5 = vrot.slane %v85_v45, %v97_v63 }
  0x48   :  { %532 = vmatprep.subr.bf16.mxu0 %v4095_v16  ;;  %293 = vmatprep.mubr.bf16.mxu1 %v4829_v0 }
  0x4a   :  { %570 = vmatpush1.bf16.msra.mxu1 %v4104_v19 }
  0x4b   :  { %533 = vmatpush1.bf16.msra.mxu0 %v4102_v18  ;;  %571 = vmatprep.subr.bf16.mxu1 %v4109_v20 }
  0x4c   :  { %534 = vmatprep.subr.bf16.mxu0 %v4113_v21 }
  0x4d   :  { %3058 = vmatmul.mubr.msk.bf16.gmra.mrb[8].mxu0 %vm152_vm0, %v3392_v22  ;;  %3062 = vmatmul.mubr.msk.bf16.gmra.mrb[8].mxu1 %vm152_vm0, %v3379_v12 }
  0x4e   :  { %572 = vmatpush1.bf16.msra.mxu1 %v4119_v23  ;;  %230 = vmatprep.mubr.bf16.mxu0 %v4829_v0 }
  0x4f   :  { %535 = vmatpush1.bf16.msra.mxu0 %v4122_v24  ;;  %303 = vmatprep.mubr.bf16.mxu1 %v4829_v0 }
  0x50   :  { %536 = vmatprep.subr.bf16.mxu0 %v4126_v25  ;;  %573 = vmatprep.subr.bf16.mxu1 %v4128_v26 }
  0x52   :  { %574 = vmatpush1.bf16.msra.mxu1 %v4134_v27 }
  0x53   :  { %537 = vmatpush1.bf16.msra.mxu0 %v4137_v28  ;;  %575 = vmatprep.subr.bf16.mxu1 %v4140_v29 }
  0x54   :  { %538 = vmatprep.subr.bf16.mxu0 %v4144_v30 }
  0x55   :  { %3059 = vmatmul.mubr.msk.bf16.gmra.mrb[12].mxu0 %vm152_vm0, %v3404_v31  ;;  %3063 = vmatmul.mubr.msk.bf16.gmra.mrb[12].mxu1 %vm152_vm0, %v3392_v22  ;;  %v4281_v22 = vrot.slane %v85_v45, %v101_v1 }
  0x56   :  { %576 = vmatpush1.bf16.msra.mxu1 %v4152_v33  ;;  %313 = vmatprep.mubr.bf16.mxu1 %v4829_v0 }
  0x57   :  { %539 = vmatpush1.bf16.msra.mxu0 %v4150_v32  ;;  %558 = vmatprep.mubr.bf16.mxu0 %v4829_v0 }
  0x58   :  { %540 = vmatprep.subr.bf16.mxu0 %v4155_v34  ;;  %577 = vmatprep.subr.bf16.mxu1 %v4158_v35 }
  0x5a   :  { %578 = vmatpush1.bf16.msra.mxu1 %v4161_v36 }
  0x5b   :  { %541 = vmatpush1.bf16.msra.mxu0 %v4165_v37  ;;  %579 = vmatprep.subr.bf16.mxu1 %v4167_v38 }
  0x5c   :  { %638 = vmatprep.subr.bf16.mxu0 %v4065_v7 }
  0x5d   :  { %3064 = vmatmul.mubr.msk.bf16.gmra.mrb[16].mxu1 %vm152_vm0, %v3404_v31 }
  0x5e   :  { %559 = vmatmul.mubr.bf16.vlgmr.msra.gmra.mrb[16].mxu0 %v4829_v0  ;;  %323 = vmatprep.mubr.bf16.mxu1 %v4829_v0 }
  0x5f   :  { %580 = vmatpush1.bf16.msra.mxu1 %v4175_v39  ;;  %639 = vmatpush1.bf16.msra.mxu0 %v4067_v8 }
  0x60   :  { %581 = vmatprep.subr.bf16.mxu1 %v4178_v40  ;;  %640 = vmatprep.subr.bf16.mxu0 %v4072_v9 }
  0x61   :  { %670 = vmatprep.mubr.bf16.mxu0 %v4829_v0 }
  0x63   :  { %582 = vmatpush1.bf16.msra.mxu1 %v4184_v41  ;;  %641 = vmatpush1.bf16.msra.mxu0 %v4076_v10 }
  0x64   :  { %679 = vmatprep.subr.bf16.mxu1 %v4086_v13  ;;  %642 = vmatprep.subr.bf16.mxu0 %v4080_v11 }
  0x65   :  { %3065 = vmatmul.mubr.msk.bf16.gmra.mrb[20].mxu1 %vm152_vm0, %v4057_v4 }
  0x66   :  { %599 = vmatprep.mubr.bf16.mxu1 %v4829_v0 }
  0x67   :  { %643 = vmatpush1.bf16.msra.mxu0 %v4092_v15 }
  0x68   :  { %644 = vmatprep.subr.bf16.mxu0 %v4095_v16 }
  0x6b   :  { %645 = vmatpush1.bf16.msra.mxu0 %v4102_v18 }
  0x6c   :  { %646 = vmatprep.subr.bf16.mxu0 %v4113_v21 }
  0x6d   :  { %600 = vmatmul.mubr.bf16.vlgmr.msra.gmra.mrb[24].mxu1 %v4829_v0 }
  0x6e   :  { %680 = vmatpush1.bf16.msra.mxu1 %v4088_v14  ;;  %711 = vmatprep.mubr.bf16.mxu1 %v4829_v0 }
  0x6f   :  { %681 = vmatprep.subr.bf16.mxu1 %v4097_v17  ;;  %647 = vmatpush1.bf16.msra.mxu0 %v4122_v24 }
  0x70   :  { %648 = vmatprep.subr.bf16.mxu0 %v4126_v25 }
  0x72   :  { %682 = vmatpush1.bf16.msra.mxu1 %v4104_v19 }
  0x73   :  { %683 = vmatprep.subr.bf16.mxu1 %v4109_v20  ;;  %649 = vmatpush1.bf16.msra.mxu0 %v4137_v28 }
  0x74   :  { %650 = vmatprep.subr.bf16.mxu0 %v4144_v30 }
  0x76   :  { %684 = vmatpush1.bf16.msra.mxu1 %v4119_v23 }
  0x77   :  { %685 = vmatprep.subr.bf16.mxu1 %v4128_v26  ;;  %651 = vmatpush1.bf16.msra.mxu0 %v4150_v32 }
  0x78   :  { %652 = vmatprep.subr.bf16.mxu0 %v4155_v34 }
  0x7a   :  { %686 = vmatpush1.bf16.msra.mxu1 %v4134_v27 }
  0x7b   :  { %687 = vmatprep.subr.bf16.mxu1 %v4140_v29  ;;  %653 = vmatpush1.bf16.msra.mxu0 %v4165_v37 }
  0x7c   :  { %750 = vmatprep.subr.bf16.mxu0 %v4065_v7 }
  0x7e   :  { %688 = vmatpush1.bf16.msra.mxu1 %v4152_v33 }
  0x7f   :  { %689 = vmatprep.subr.bf16.mxu1 %v4158_v35 }
  0x82   :  { %690 = vmatpush1.bf16.msra.mxu1 %v4161_v36 }
  0x83   :  { %691 = vmatprep.subr.bf16.mxu1 %v4167_v38 }
  0x86   :  { %692 = vmatpush1.bf16.msra.mxu1 %v4175_v39 }
  0x87   :  { %693 = vmatprep.subr.bf16.mxu1 %v4178_v40 }
  0x8a   :  { %694 = vmatpush1.bf16.msra.mxu1 %v4184_v41 }
  0x8b   :  { %791 = vmatprep.subr.bf16.mxu1 %v4086_v13 }
 0x110   :  { %v4245_v49 = vpop.f32.mrb[0].mxu0  ;;  %v242_v50 = vpop.f32.mrb[0].mxu1 }
 0x111   :  { %v4248_v51 = vadd.f32 %v242_v50, %v4239_v47  ;;  %v4250_v52 = vpop.f32.mrb[1].mxu0  ;;  %v244_v53 = vpop.f32.mrb[1].mxu1 }
 0x112   :  { %v4253_v54 = vadd.f32 %v244_v53, %v4243_v48  ;;  %v206_v55 = vpop.f32.mrb[2].mxu0  ;;  %v246_v56 = vpop.f32.mrb[2].mxu1 }
 0x113   :  { %4834 = vst [vmem:[#allocation11_spill] sm:$0xff] %v4248_v51  ;;  %v4256_v57 = vadd.f32 %v206_v55, %v4239_v47  ;;  %v4259_v58 = vadd.f32 %v246_v56, %v4239_v47  ;;  %v208_v59 = vpop.f32.mrb[3].mxu0  ;;  %v248_v60 = vpop.f32.mrb[3].mxu1 }
 0x114   :  { %4835 = vst [vmem:[#allocation12_spill] sm:$0xff] %v4253_v54  ;;  %v4262_v61 = vadd.f32 %v208_v59, %v4243_v48  ;;  %v4265_v62 = vadd.f32 %v248_v60, %v4243_v48 }
 0x115   :  { %4836 = vst [vmem:[#allocation13_spill] sm:$0xff] %v4259_v58 }
 0x116   :  { %4837 = vst [vmem:[#allocation14_spill] sm:$0xff] %v4265_v62 }
 0x118   :  { %v212_v2 = vpop.f32.mrb[4].mxu0  ;;  %v4269_v3 = vpop.f32.mrb[4].mxu1 }
 0x119   :  { %v4272_v4 = vadd.f32 %v212_v2, %v4239_v47  ;;  %v214_v6 = vpop.f32.mrb[5].mxu0  ;;  %v4276_v7 = vpop.f32.mrb[5].mxu1 }
 0x11a   :  { %v4279_v12 = vadd.f32 %v214_v6, %v4243_v48  ;;  %v216_v31 = vpop.f32.mrb[6].mxu0  ;;  %v289_v42 = vpop.f32.mrb[6].mxu1 }
 0x11b   :  { %v4284_v50 = vadd.f32 %v216_v31, %v4239_v47  ;;  %v4287_v53 = vadd.f32 %v289_v42, %v4274_v5  ;;  %v218_v55 = vpop.f32.mrb[7].mxu0  ;;  %v291_v56 = vpop.f32.mrb[7].mxu1 }
 0x11c   :  { %v4290_v59 = vadd.f32 %v218_v55, %v4243_v48  ;;  %v4293_v60 = vadd.f32 %v291_v56, %v4281_v22 }
 0x120   :  { %v222_v63 = vpop.f32.mrb[8].mxu0  ;;  %v295_v2 = vpop.f32.mrb[8].mxu1 }
 0x121   :  { %v4296_v45 = vadd.f32 %v222_v63, %v4239_v47  ;;  %v4299_v1 = vadd.f32 %v295_v2, %v4274_v5  ;;  %v224_v6 = vpop.f32.mrb[9].mxu0  ;;  %v297_v31 = vpop.f32.mrb[9].mxu1 }
 0x122   :  { %v4302_v42 = vadd.f32 %v224_v6, %v4243_v48  ;;  %v4305_v46 = vadd.f32 %v297_v31, %v4281_v22  ;;  %v226_v55 = vpop.f32.mrb[10].mxu0  ;;  %v299_v44 = vpop.f32.mrb[10].mxu1 }
 0x123   :  { %4838 = vst [vmem:[#allocation15_spill] sm:$0xff] %v4296_v45  ;;  %v4308_v56 = vadd.f32 %v226_v55, %v4239_v47  ;;  %v4311_v0 = vadd.f32 %v299_v44, %v4274_v5  ;;  %v228_v63 = vpop.f32.mrb[11].mxu0  ;;  %v301_v43 = vpop.f32.mrb[11].mxu1 }
 0x124   :  { %4839 = vst [vmem:[#allocation16_spill] sm:$0xff] %v4302_v42  ;;  %v4314_v2 = vadd.f32 %v228_v63, %v4243_v48  ;;  %v4317_v62 = vadd.f32 %v301_v43, %v4281_v22 }
 0x125   :  { %4840 = vst [vmem:[#allocation17_spill] sm:$0xff] %v4308_v56 }
 0x126   :  { %4841 = vst [vmem:[#allocation18_spill] sm:$0xff] %v4314_v2 }
 0x128   :  { %v232_v6 = vpop.f32.mrb[12].mxu0  ;;  %v305_v58 = vpop.f32.mrb[12].mxu1 }
 0x129   :  { %v4320_v31 = vadd.f32 %v232_v6, %v4239_v47  ;;  %v4323_v54 = vadd.f32 %v305_v58, %v4274_v5  ;;  %v234_v55 = vpop.f32.mrb[13].mxu0  ;;  %v307_v51 = vpop.f32.mrb[13].mxu1 }
 0x12a   :  { %v4326_v44 = vadd.f32 %v234_v55, %v4243_v48  ;;  %v4329_v56 = vadd.f32 %v307_v51, %v4281_v22  ;;  %v236_v63 = vpop.f32.mrb[14].mxu0  ;;  %v309_v2 = vpop.f32.mrb[14].mxu1  ;;  %v203_v51 = vadd.f32 %v4245_v49, %v4239_v47 }
 0x12b   :  { %4842 = vst [vmem:[#allocation19_spill] sm:$0xff] %v4320_v31  ;;  %4843 = vst [vmem:[#allocation20_spill] sm:$0xff] %v4323_v54  ;;  %v4332_v43 = vadd.f32 %v236_v63, %v4239_v47  ;;  %v4335_v42 = vadd.f32 %v309_v2, %v4274_v5  ;;  %v238_v6 = vpop.f32.mrb[15].mxu0  ;;  %v311_v31 = vpop.f32.mrb[15].mxu1 }
 0x12c   :  { %4844 = vst [vmem:[#allocation21_spill] sm:$0xff] %v4326_v44  ;;  %4845 = vst [vmem:[#allocation22_spill] sm:$0xff] %v4329_v56  ;;  %v4338_v58 = vadd.f32 %v238_v6, %v4243_v48  ;;  %v4341_v54 = vadd.f32 %v311_v31, %v4281_v22  ;;  %v205_v44 = vadd.f32 %v4250_v52, %v4243_v48 }
 0x12d   :  { %4846 = vst [vmem:[#allocation23_spill] sm:$0xff] %v4332_v43  ;;  %4847 = vst [vmem:[#allocation24_spill] sm:$0xff] %v4335_v42 }
 0x12e   :  { %4848 = vst [vmem:[#allocation25_spill] sm:$0xff] %v4338_v58  ;;  %4849 = vst [vmem:[#allocation26_spill] sm:$0xff] %v4341_v54 }
 0x130   :  { %v315_v55 = vpop.f32.mrb[16].mxu1 }
 0x131   :  { %v4348_v63 = vadd.f32 %v315_v55, %v4274_v5  ;;  %v560_v2 = vpop.f32.mrb[16].mxu0  ;;  %v317_v43 = vpop.f32.mrb[17].mxu1 }
 0x132   :  { %v608_v42 = vadd.f32 %v560_v2, %v203_v51  ;;  %v4351_v56 = vadd.f32 %v317_v43, %v4281_v22  ;;  %v562_v6 = vpop.f32.mrb[17].mxu0  ;;  %v319_v58 = vpop.f32.mrb[18].mxu1 }
 0x133   :  { %4850 = vst [vmem:[#allocation27_spill] sm:$0xff] %v4348_v63  ;;  %v609_v31 = vadd.f32 %v562_v6, %v205_v44  ;;  %v4354_v54 = vadd.f32 %v319_v58, %v4274_v5  ;;  %v564_v47 = vpop.f32.mrb[18].mxu0  ;;  %v321_v49 = vpop.f32.mrb[19].mxu1 }
 0x134   :  { %4851 = vst [vmem:[#allocation28_spill] sm:$0xff] %v4351_v56  ;;  %v3098_v45 = vmul.f32 -1.442695, %v608_v42  ;;  %v4357_v48 = vadd.f32 %v321_v49, %v4281_v22  ;;  %v565_v52 = vpop.f32.mrb[19].mxu0  ;;  %v288_v49 = vadd.f32 %v4276_v7, %v4281_v22 }
 0x135   :  { %4852 = vst [vmem:[#allocation29_spill] sm:$0xff] %v4354_v54  ;;  %v3099_v55 = vmul.f32 -1.442695, %v609_v31 }
 0x136   :  { %4853 = vst [vmem:[#allocation30_spill] sm:$0xff] %v4357_v48  ;;  %3690 = vpow2.f32 %v3098_v45  ;;  %v286_v45 = vadd.f32 %v4269_v3, %v4274_v5 }
 0x137   :  { %3692 = vpow2.f32 %v3099_v55 }
 0x138   :  { %v325_v51 = vpop.f32.mrb[20].mxu1 }
 0x139   :  { %v4360_v43 = vadd.f32 %v325_v51, %v4274_v5  ;;  %v327_v2 = vpop.f32.mrb[21].mxu1 }
 0x13a   :  { %v4363_v44 = vadd.f32 %v327_v2, %v4281_v22  ;;  %v329_v58 = vpop.f32.mrb[22].mxu1 }
 0x13b   :  { %4854 = vst [vmem:[#allocation31_spill] sm:$0xff] %v4360_v43  ;;  %v4366_v6 = vadd.f32 %v329_v58, %v4274_v5  ;;  %v331_v42 = vpop.f32.mrb[23].mxu1 }
 0x13c   :  { %4855 = vst [vmem:[#allocation32_spill] sm:$0xff] %v4363_v44  ;;  %v4369_v47 = vadd.f32 %v331_v42, %v4281_v22 }
 0x13d   :  { %4856 = vst [vmem:[#allocation33_spill] sm:$0xff] %v4366_v6 }
 0x13e   :  { %4857 = vst [vmem:[#allocation34_spill] sm:$0xff] %v4369_v47 }
 0x140   :  { %v3691_v31 = vpop.eup %3690  ;;  %v601_v52 = vpop.f32.mrb[24].mxu1 }
 0x141   :  { %v3693_v55 = vpop.eup %3692  ;;  %v615_v51 = vadd.f32 1.0, %v3691_v31  ;;  %v610_v2 = vadd.f32 %v601_v52, %v286_v45  ;;  %v603_v44 = vpop.f32.mrb[25].mxu1 }
 0x142   :  { %v621_v43 = vadd.f32 1.0, %v3693_v55  ;;  %v611_v48 = vadd.f32 %v603_v44, %v288_v49  ;;  %v605_v58 = vpop.f32.mrb[26].mxu1 }
 0x143   :  { %3694 = vrcp.f32 %v615_v51  ;;  %v606_v6 = vpop.f32.mrb[27].mxu1 }
 0x144   :  { %3696 = vrcp.f32 %v621_v43  ;;  %v3100_v42 = vmul.f32 -1.442695, %v611_v48 }
 0x145   :  { %3698 = vtanh.f32 %v610_v2 }
 0x146   :  { %3700 = vpow2.f32 %v3100_v42 }
 0x14d   :  { %v3695_v47 = vpop.eup %3694 }
 0x14e   :  { %v3697_v3 = vpop.eup %3696 }
 0x14f   :  { %v3699_v5 = vpop.eup %3698  ;;  %v631_v54 = vmul.f32 0.0, %v3697_v3 }
 0x150   :  { %v3701_v56 = vpop.eup %3700  ;;  %v632_v7 = vmul.f32 %v3699_v5, %v3695_v47  ;;  %v4422_v5 = vld [vmem:[#allocation3] ss:$16 sps:$4 sm:$0xff]  }
 0x151   :  { %v628_v22 = vadd.f32 1.0, %v3701_v56 }
 0x152   :  { %v4375_v63 = vadd.f32 %v632_v7, %v631_v54  ;;  %v4858_v54 = vmov 0   ;;  %v4425_v7 = vld [vmem:[#allocation3 + $0x8] ss:$16 sps:$4 sm:$0xff]  }
 0x153   :  { %3702 = vrcp.f32 %v628_v22  ;;  %v4431_v22 = vld [vmem:[#allocation3 + $0x2c] ss:$16 sps:$4 sm:$0xff]  }
 0x154   :  { %3704 = vtanh.f32 %v4375_v63 }
 0x15d   :  { %v3703_v44 = vpop.eup %3702 }
 0x15e   :  { %v3705_v45 = vpop.eup %3704 }
 0x15f   :  { %v635_v31 = vmul.f32 %v3705_v45, %v3703_v44  ;;  %v4436_v44 = vld [vmem:[#allocation3 + $0x20] ss:$16 sps:$4 sm:$0xff]   ;;  %v4439_v45 = vld [vmem:[#allocation3 + $0x28] ss:$16 sps:$4 sm:$0xff]  }
 0x161   :  { %v636_v6 = vpack.c.bf16 %v635_v31, %v635_v31  ;;  %v4442_v31 = vld [vmem:[#allocation3 + $0x44] ss:$16 sps:$4 sm:$0xff]  }
 0x163   :  { %637 = vst [vmem:[#allocation2] sm:$0xf] %v636_v6  ;;  %671 = vmatmul.mubr.bf16.vlgmr.msra.gmra.mrb[20].mxu0 %v636_v6  ;;  %712 = vmatmul.mubr.bf16.vlgmr.msra.gmra.mrb[28].mxu1 %v636_v6  ;;  %v4445_v6 = vld [vmem:[#allocation3 + $0x4c] ss:$16 sps:$4 sm:$0xff]  }
 0x164   :  { %751 = vmatpush1.bf16.msra.mxu0 %v4067_v8  ;;  %792 = vmatpush1.bf16.msra.mxu1 %v4088_v14  ;;  %v4410_v8 = vld [vmem:[#allocation3 + $0x4] ss:$16 sps:$4 sm:$0xff]  }
 0x165   :  { %752 = vmatprep.subr.bf16.mxu0 %v4072_v9  ;;  %793 = vmatprep.subr.bf16.mxu1 %v4097_v17 }
 0x166   :  { %782 = vmatprep.mubr.bf16.mxu0 %v4858_v54  ;;  %823 = vmatprep.mubr.bf16.mxu1 %v4858_v54 }
 0x168   :  { %753 = vmatpush1.bf16.msra.mxu0 %v4076_v10  ;;  %794 = vmatpush1.bf16.msra.mxu1 %v4104_v19 }
 0x169   :  { %754 = vmatprep.subr.bf16.mxu0 %v4080_v11  ;;  %795 = vmatprep.subr.bf16.mxu1 %v4109_v20 }
 0x16c   :  { %755 = vmatpush1.bf16.msra.mxu0 %v4092_v15  ;;  %796 = vmatpush1.bf16.msra.mxu1 %v4119_v23 }
 0x16d   :  { %756 = vmatprep.subr.bf16.mxu0 %v4095_v16  ;;  %797 = vmatprep.subr.bf16.mxu1 %v4128_v26 }
 0x170   :  { %757 = vmatpush1.bf16.msra.mxu0 %v4102_v18  ;;  %798 = vmatpush1.bf16.msra.mxu1 %v4134_v27 }
 0x171   :  { %758 = vmatprep.subr.bf16.mxu0 %v4113_v21  ;;  %799 = vmatprep.subr.bf16.mxu1 %v4140_v29 }
 0x174   :  { %759 = vmatpush1.bf16.msra.mxu0 %v4122_v24  ;;  %800 = vmatpush1.bf16.msra.mxu1 %v4152_v33 }
 0x175   :  { %760 = vmatprep.subr.bf16.mxu0 %v4126_v25  ;;  %801 = vmatprep.subr.bf16.mxu1 %v4158_v35 }
 0x178   :  { %761 = vmatpush1.bf16.msra.mxu0 %v4137_v28  ;;  %802 = vmatpush1.bf16.msra.mxu1 %v4161_v36 }
 0x179   :  { %762 = vmatprep.subr.bf16.mxu0 %v4144_v30  ;;  %803 = vmatprep.subr.bf16.mxu1 %v4167_v38 }
 0x17c   :  { %763 = vmatpush1.bf16.msra.mxu0 %v4150_v32  ;;  %804 = vmatpush1.bf16.msra.mxu1 %v4175_v39 }
 0x17d   :  { %764 = vmatprep.subr.bf16.mxu0 %v4155_v34  ;;  %805 = vmatprep.subr.bf16.mxu1 %v4178_v40 }
 0x180   :  { %765 = vmatpush1.bf16.msra.mxu0 %v4165_v37  ;;  %806 = vmatpush1.bf16.msra.mxu1 %v4184_v41 }
 0x181   :  { %862 = vmatprep.subr.bf16.mxu0 %v4410_v8  ;;  %903 = vmatprep.subr.bf16.mxu1 %v4086_v13 }
 0x236   :  { %v672_v9 = vpop.f32.mrb[20].mxu0  ;;  %v713_v10 = vpop.f32.mrb[28].mxu1 }
 0x237   :  { %v720_v11 = vadd.f32 %v672_v9, %v4256_v57  ;;  %v722_v14 = vadd.f32 %v713_v10, %v4287_v53  ;;  %v674_v15 = vpop.f32.mrb[21].mxu0  ;;  %v715_v16 = vpop.f32.mrb[29].mxu1  ;;  %v4448_v9 = vld [vmem:[#allocation3 + $0x40] ss:$16 sps:$4 sm:$0xff]   ;;  %v4451_v10 = vld [vmem:[#allocation3 + $0x48] ss:$16 sps:$4 sm:$0xff]  }
 0x238   :  { %v721_v17 = vadd.f32 %v674_v15, %v4262_v61  ;;  %v723_v18 = vadd.f32 %v715_v16, %v4293_v60  ;;  %v676_v19 = vpop.f32.mrb[22].mxu0  ;;  %v717_v20 = vpop.f32.mrb[30].mxu1  ;;  %v4462_v15 = vld [vmem:[#allocation3 + $0x84] ss:$16 sps:$4 sm:$0xff]   ;;  %v4466_v16 = vld [vmem:[#allocation3 + $0x80] ss:$16 sps:$4 sm:$0xff]  }
 0x239   :  { %v3101_v21 = vmul.f32 -1.442695, %v720_v11  ;;  %v677_v23 = vpop.f32.mrb[23].mxu0  ;;  %v718_v24 = vpop.f32.mrb[31].mxu1  ;;  %v4454_v11 = vld [vmem:[#allocation3 + $0x64] ss:$16 sps:$4 sm:$0xff]  }
 0x23a   :  { %v3102_v25 = vmul.f32 -1.442695, %v721_v17  ;;  %v3103_v13 = vmul.f32 -1.442695, %v723_v18  ;;  %v4470_v17 = vld [vmem:[#allocation3 + $0xa4] ss:$16 sps:$4 sm:$0xff]  }
 0x23b   :  { %3706 = vpow2.f32 %v3101_v21 }
 0x23c   :  { %3708 = vpow2.f32 %v3102_v25 }
 0x23d   :  { %3710 = vpow2.f32 %v3103_v13 }
 0x23e   :  { %3712 = vtanh.f32 %v722_v14  ;;  %v4458_v14 = vld [vmem:[#allocation3 + $0x60] ss:$16 sps:$4 sm:$0xff]  }
 0x245   :  { %v3707_v56 = vpop.eup %3706 }
 0x246   :  { %v3709_v48 = vpop.eup %3708  ;;  %v727_v57 = vadd.f32 1.0, %v3707_v56 }
 0x247   :  { %v733_v53 = vadd.f32 1.0, %v3709_v48  ;;  %v3711_v61 = vpop.eup %3710 }
 0x248   :  { %3714 = vrcp.f32 %v727_v57  ;;  %v3713_v43 = vpop.eup %3712  ;;  %v740_v52 = vadd.f32 1.0, %v3711_v61 }
 0x249   :  { %3716 = vrcp.f32 %v733_v53 }
 0x24a   :  { %3718 = vrcp.f32 %v740_v52  ;;  %v4525_v52 = vld [vmem:[#allocation3 + $0xac] ss:$16 sps:$4 sm:$0xff]  }
 0x252   :  { %v3715_v60 = vpop.eup %3714 }
 0x253   :  { %v3717_v47 = vpop.eup %3716  ;;  %v744_v49 = vmul.f32 %v3715_v60, %v3713_v43  ;;  %v4509_v43 = vld [vmem:[#allocation3 + $0x6c] ss:$16 sps:$4 sm:$0xff]   ;;  %v4513_v60 = vld [vmem:[#allocation3 + $0x68] ss:$16 sps:$4 sm:$0xff]  }
 0x254   :  { %v743_v55 = vmul.f32 %v3717_v47, %v4375_v63  ;;  %v3719_v2 = vpop.eup %3718  ;;  %v4428_v63 = vld [vmem:[#allocation3 + $0x24] ss:$16 sps:$4 sm:$0xff]   ;;  %v4517_v47 = vld [vmem:[#allocation3 + $0x8c] ss:$16 sps:$4 sm:$0xff]  }
 0x256   :  { %v4419_v51 = vadd.f32 %v744_v49, %v743_v55  ;;  %v4521_v49 = vld [vmem:[#allocation3 + $0x88] ss:$16 sps:$4 sm:$0xff]   ;;  %v4528_v55 = vld [vmem:[#allocation3 + $0xa0] ss:$16 sps:$4 sm:$0xff]  }
 0x258   :  { %3720 = vtanh.f32 %v4419_v51 }
 0x262   :  { %v3721_v58 = vpop.eup %3720 }
 0x263   :  { %v747_v42 = vmul.f32 %v3721_v58, %v3719_v2  ;;  %v4534_v2 = vld [vmem:[#allocation3 + $0xc4] ss:$16 sps:$4 sm:$0xff]   ;;  %v4537_v58 = vld [vmem:[#allocation3 + $0xcc] ss:$16 sps:$4 sm:$0xff]  }
 0x265   :  { %v748_v3 = vpack.c.bf16 %v747_v42, %v747_v42  ;;  %v4540_v42 = vld [vmem:[#allocation3 + $0xc0] ss:$16 sps:$4 sm:$0xff]  }
 0x267   :  { %749 = vst [vmem:[#allocation2 + $0x4] sm:$0xf] %v748_v3  ;;  %783 = vmatmul.mubr.bf16.vlgmr.msra.gmra.mrb[24].mxu0 %v748_v3  ;;  %824 = vmatmul.mubr.bf16.vlgmr.msra.gmra.mrb[32].mxu1 %v748_v3  ;;  %v4543_v3 = vld [vmem:[#allocation3 + $0xc8] ss:$16 sps:$4 sm:$0xff]  }
 0x268   :  { %863 = vmatpush1.bf16.msra.mxu0 %v4422_v5  ;;  %904 = vmatpush1.bf16.msra.mxu1 %v4425_v7 }
 0x269   :  { %864 = vmatprep.subr.bf16.mxu0 %v4428_v63  ;;  %905 = vmatprep.subr.bf16.mxu1 %v4431_v22 }
 0x26a   :  { %894 = vmatprep.mubr.bf16.mxu0 %v4858_v54  ;;  %935 = vmatprep.mubr.bf16.mxu1 %v4858_v54 }
 0x26c   :  { %865 = vmatpush1.bf16.msra.mxu0 %v4436_v44  ;;  %906 = vmatpush1.bf16.msra.mxu1 %v4439_v45 }
 0x26d   :  { %866 = vmatprep.subr.bf16.mxu0 %v4442_v31  ;;  %907 = vmatprep.subr.bf16.mxu1 %v4445_v6 }
 0x270   :  { %867 = vmatpush1.bf16.msra.mxu0 %v4448_v9  ;;  %908 = vmatpush1.bf16.msra.mxu1 %v4451_v10 }
 0x271   :  { %868 = vmatprep.subr.bf16.mxu0 %v4454_v11  ;;  %909 = vmatprep.subr.bf16.mxu1 %v4128_v26  ;;  %v4485_v26 = vld [vmem:[#allocation3 + $0xc] ss:$16 sps:$4 sm:$0xff]  }
 0x274   :  { %869 = vmatpush1.bf16.msra.mxu0 %v4458_v14  ;;  %910 = vmatpush1.bf16.msra.mxu1 %v4134_v27 }
 0x275   :  { %870 = vmatprep.subr.bf16.mxu0 %v4462_v15  ;;  %911 = vmatprep.subr.bf16.mxu1 %v4140_v29 }
 0x278   :  { %871 = vmatpush1.bf16.msra.mxu0 %v4466_v16  ;;  %912 = vmatpush1.bf16.msra.mxu1 %v4152_v33 }
 0x279   :  { %872 = vmatprep.subr.bf16.mxu0 %v4470_v17  ;;  %913 = vmatprep.subr.bf16.mxu1 %v4158_v35 }
 0x27c   :  { %873 = vmatpush1.bf16.msra.mxu0 %v4137_v28  ;;  %914 = vmatpush1.bf16.msra.mxu1 %v4161_v36 }
 0x27d   :  { %874 = vmatprep.subr.bf16.mxu0 %v4144_v30  ;;  %915 = vmatprep.subr.bf16.mxu1 %v4167_v38 }
 0x280   :  { %875 = vmatpush1.bf16.msra.mxu0 %v4150_v32  ;;  %916 = vmatpush1.bf16.msra.mxu1 %v4175_v39 }
 0x281   :  { %876 = vmatprep.subr.bf16.mxu0 %v4155_v34  ;;  %917 = vmatprep.subr.bf16.mxu1 %v4178_v40 }
 0x284   :  { %877 = vmatpush1.bf16.msra.mxu0 %v4165_v37  ;;  %918 = vmatpush1.bf16.msra.mxu1 %v4184_v41 }
 0x285   :  { %974 = vmatprep.subr.bf16.mxu0 %v4410_v8  ;;  %1015 = vmatprep.subr.bf16.mxu1 %v4485_v26 }
 0x33a   :  { %v784_v27 = vpop.f32.mrb[24].mxu0  ;;  %v825_v28 = vpop.f32.mrb[32].mxu1 }
 0x33b   :  { %v832_v29 = vadd.f32 %v784_v27, %v4272_v4  ;;  %v834_v30 = vadd.f32 %v825_v28, %v4299_v1  ;;  %v786_v32 = vpop.f32.mrb[25].mxu0  ;;  %v827_v33 = vpop.f32.mrb[33].mxu1  ;;  %v4546_v27 = vld [vmem:[#allocation3 + $0xe4] ss:$16 sps:$4 sm:$0xff]   ;;  %v4549_v28 = vld [vmem:[#allocation3 + $0xec] ss:$16 sps:$4 sm:$0xff]  }
 0x33c   :  { %v833_v34 = vadd.f32 %v786_v32, %v4279_v12  ;;  %v835_v35 = vadd.f32 %v827_v33, %v4305_v46  ;;  %v788_v36 = vpop.f32.mrb[26].mxu0  ;;  %v829_v37 = vpop.f32.mrb[34].mxu1 }
 0x33d   :  { %v3104_v38 = vmul.f32 -1.442695, %v832_v29  ;;  %v789_v39 = vpop.f32.mrb[27].mxu0  ;;  %v830_v40 = vpop.f32.mrb[35].mxu1  ;;  %v4552_v29 = vld [vmem:[#allocation3 + $0xe0] ss:$16 sps:$4 sm:$0xff]  }
 0x33e   :  { %v3105_v41 = vmul.f32 -1.442695, %v833_v34  ;;  %v3106_v18 = vmul.f32 -1.442695, %v835_v35 }
 0x33f   :  { %3722 = vpow2.f32 %v3104_v38 }
 0x340   :  { %3724 = vpow2.f32 %v3105_v41 }
 0x341   :  { %3726 = vpow2.f32 %v3106_v18 }
 0x342   :  { %3728 = vtanh.f32 %v834_v30  ;;  %v4555_v30 = vld [vmem:[#allocation3 + $0xe8] ss:$16 sps:$4 sm:$0xff]  }
 0x349   :  { %v3723_v19 = vpop.eup %3722 }
 0x34a   :  { %v3725_v20 = vpop.eup %3724  ;;  %v839_v4 = vadd.f32 1.0, %v3723_v19 }
 0x34b   :  { %v845_v1 = vadd.f32 1.0, %v3725_v20  ;;  %v3727_v12 = vpop.eup %3726 }
 0x34c   :  { %3730 = vrcp.f32 %v839_v4  ;;  %v3729_v21 = vpop.eup %3728  ;;  %v852_v25 = vadd.f32 1.0, %v3727_v12 }
 0x34d   :  { %3732 = vrcp.f32 %v845_v1 }
 0x34e   :  { %3734 = vrcp.f32 %v852_v25 }
 0x356   :  { %v3731_v46 = vpop.eup %3730 }
 0x357   :  { %v3733_v23 = vpop.eup %3732  ;;  %v856_v24 = vmul.f32 %v3731_v46, %v3729_v21 }
 0x358   :  { %v855_v13 = vmul.f32 %v3733_v23, %v4419_v51  ;;  %v3735_v48 = vpop.eup %3734  ;;  %v4531_v51 = vld [vmem:[#allocation3 + $0xa8] ss:$16 sps:$4 sm:$0xff]  }
 0x35a   :  { %v4493_v56 = vadd.f32 %v856_v24, %v855_v13 }
 0x35c   :  { %3736 = vtanh.f32 %v4493_v56 }
 0x366   :  { %v3737_v57 = vpop.eup %3736 }
 0x367   :  { %v859_v53 = vmul.f32 %v3737_v57, %v3735_v48 }
 0x369   :  { %v860_v61 = vpack.c.bf16 %v859_v53, %v859_v53 }
 0x36b   :  { %861 = vst [vmem:[#allocation2 + $0x8] sm:$0xf] %v860_v61  ;;  %895 = vmatmul.mubr.bf16.vlgmr.msra.gmra.mrb[28].mxu0 %v860_v61  ;;  %936 = vmatmul.mubr.bf16.vlgmr.msra.gmra.mrb[36].mxu1 %v860_v61 }
 0x36c   :  { %975 = vmatpush1.bf16.msra.mxu0 %v4422_v5  ;;  %1016 = vmatpush1.bf16.msra.mxu1 %v4425_v7 }
 0x36d   :  { %976 = vmatprep.subr.bf16.mxu0 %v4428_v63  ;;  %1017 = vmatprep.subr.bf16.mxu1 %v4431_v22 }
 0x36e   :  { %1006 = vmatprep.mubr.bf16.mxu0 %v4858_v54  ;;  %1047 = vmatprep.mubr.bf16.mxu1 %v4858_v54 }
 0x370   :  { %977 = vmatpush1.bf16.msra.mxu0 %v4436_v44  ;;  %1018 = vmatpush1.bf16.msra.mxu1 %v4439_v45 }
 0x371   :  { %978 = vmatprep.subr.bf16.mxu0 %v4442_v31  ;;  %1019 = vmatprep.subr.bf16.mxu1 %v4445_v6 }
 0x374   :  { %979 = vmatpush1.bf16.msra.mxu0 %v4448_v9  ;;  %1020 = vmatpush1.bf16.msra.mxu1 %v4451_v10 }
 0x375   :  { %980 = vmatprep.subr.bf16.mxu0 %v4454_v11  ;;  %1021 = vmatprep.subr.bf16.mxu1 %v4509_v43 }
 0x378   :  { %981 = vmatpush1.bf16.msra.mxu0 %v4458_v14  ;;  %1022 = vmatpush1.bf16.msra.mxu1 %v4513_v60 }
 0x379   :  { %982 = vmatprep.subr.bf16.mxu0 %v4462_v15  ;;  %1023 = vmatprep.subr.bf16.mxu1 %v4517_v47 }
 0x37c   :  { %983 = vmatpush1.bf16.msra.mxu0 %v4466_v16  ;;  %1024 = vmatpush1.bf16.msra.mxu1 %v4521_v49 }
 0x37d   :  { %984 = vmatprep.subr.bf16.mxu0 %v4470_v17  ;;  %1025 = vmatprep.subr.bf16.mxu1 %v4525_v52 }
 0x380   :  { %985 = vmatpush1.bf16.msra.mxu0 %v4528_v55  ;;  %1026 = vmatpush1.bf16.msra.mxu1 %v4531_v51 }
 0x381   :  { %986 = vmatprep.subr.bf16.mxu0 %v4534_v2  ;;  %1027 = vmatprep.subr.bf16.mxu1 %v4537_v58 }
 0x384   :  { %987 = vmatpush1.bf16.msra.mxu0 %v4540_v42  ;;  %1028 = vmatpush1.bf16.msra.mxu1 %v4543_v3 }
 0x385   :  { %988 = vmatprep.subr.bf16.mxu0 %v4546_v27  ;;  %1029 = vmatprep.subr.bf16.mxu1 %v4549_v28 }
 0x388   :  { %989 = vmatpush1.bf16.msra.mxu0 %v4552_v29  ;;  %1030 = vmatpush1.bf16.msra.mxu1 %v4555_v30 }
 0x389   :  { %1086 = vmatprep.subr.bf16.mxu0 %v4410_v8  ;;  %1127 = vmatprep.subr.bf16.mxu1 %v4485_v26 }
 0x43e   :  { %v896_v32 = vpop.f32.mrb[28].mxu0  ;;  %v937_v33 = vpop.f32.mrb[36].mxu1 }
 0x43f   :  { %v944_v34 = vadd.f32 %v896_v32, %v4284_v50  ;;  %v946_v35 = vadd.f32 %v937_v33, %v4311_v0  ;;  %v898_v36 = vpop.f32.mrb[29].mxu0  ;;  %v939_v37 = vpop.f32.mrb[37].mxu1 }
 0x440   :  { %v945_v38 = vadd.f32 %v898_v36, %v4290_v59  ;;  %v947_v39 = vadd.f32 %v939_v37, %v4317_v62  ;;  %v900_v40 = vpop.f32.mrb[30].mxu0  ;;  %v941_v41 = vpop.f32.mrb[38].mxu1  ;;  %v4860_v36 = vld [vmem:[#allocation20_spill] sm:$0xff] }
 0x441   :  { %v3107_v18 = vmul.f32 -1.442695, %v944_v34  ;;  %v901_v19 = vpop.f32.mrb[31].mxu0  ;;  %v942_v20 = vpop.f32.mrb[39].mxu1  ;;  %v4859_v34 = vld [vmem:[#allocation15_spill] sm:$0xff]  ;;  %v4861_v40 = vld [vmem:[#allocation16_spill] sm:$0xff] }
 0x442   :  { %v3108_v4 = vmul.f32 -1.442695, %v945_v38  ;;  %v3109_v1 = vmul.f32 -1.442695, %v947_v39 }
 0x443   :  { %3738 = vpow2.f32 %v3107_v18  ;;  %v4862_v18 = vld [vmem:[#allocation22_spill] sm:$0xff] }
 0x444   :  { %3740 = vpow2.f32 %v3108_v4 }
 0x445   :  { %3742 = vpow2.f32 %v3109_v1 }
 0x446   :  { %3744 = vtanh.f32 %v946_v35 }
 0x44d   :  { %v3739_v12 = vpop.eup %3738 }
 0x44e   :  { %v3741_v21 = vpop.eup %3740  ;;  %v951_v50 = vadd.f32 1.0, %v3739_v12 }
 0x44f   :  { %v957_v0 = vadd.f32 1.0, %v3741_v21  ;;  %v3743_v59 = vpop.eup %3742 }
 0x450   :  { %3746 = vrcp.f32 %v951_v50  ;;  %v3745_v46 = vpop.eup %3744  ;;  %v964_v25 = vadd.f32 1.0, %v3743_v59 }
 0x451   :  { %3748 = vrcp.f32 %v957_v0 }
 0x452   :  { %3750 = vrcp.f32 %v964_v25 }
 0x45a   :  { %v3747_v62 = vpop.eup %3746 }
 0x45b   :  { %v3749_v23 = vpop.eup %3748  ;;  %v968_v24 = vmul.f32 %v3747_v62, %v3745_v46 }
 0x45c   :  { %v967_v13 = vmul.f32 %v3749_v23, %v4493_v56  ;;  %v3751_v57 = vpop.eup %3750 }
 0x45e   :  { %v4565_v48 = vadd.f32 %v968_v24, %v967_v13 }
 0x460   :  { %3752 = vtanh.f32 %v4565_v48 }
 0x46a   :  { %v3753_v53 = vpop.eup %3752 }
 0x46b   :  { %v971_v61 = vmul.f32 %v3753_v53, %v3751_v57 }
 0x46d   :  { %v972_v32 = vpack.c.bf16 %v971_v61, %v971_v61 }
 0x46f   :  { %973 = vst [vmem:[#allocation2 + $0xc] sm:$0xf] %v972_v32  ;;  %1007 = vmatmul.mubr.bf16.vlgmr.msra.gmra.mrb[32].mxu0 %v972_v32  ;;  %1048 = vmatmul.mubr.bf16.vlgmr.msra.gmra.mrb[40].mxu1 %v972_v32 }
 0x470   :  { %1087 = vmatpush1.bf16.msra.mxu0 %v4422_v5  ;;  %1128 = vmatpush1.bf16.msra.mxu1 %v4425_v7 }
 0x471   :  { %1088 = vmatprep.subr.bf16.mxu0 %v4428_v63  ;;  %1129 = vmatprep.subr.bf16.mxu1 %v4431_v22 }
 0x472   :  { %1118 = vmatprep.mubr.bf16.mxu0 %v4858_v54  ;;  %1159 = vmatprep.mubr.bf16.mxu1 %v4858_v54 }
 0x474   :  { %1089 = vmatpush1.bf16.msra.mxu0 %v4436_v44  ;;  %1130 = vmatpush1.bf16.msra.mxu1 %v4439_v45 }
 0x475   :  { %1090 = vmatprep.subr.bf16.mxu0 %v4442_v31  ;;  %1131 = vmatprep.subr.bf16.mxu1 %v4445_v6 }
 0x478   :  { %1091 = vmatpush1.bf16.msra.mxu0 %v4448_v9  ;;  %1132 = vmatpush1.bf16.msra.mxu1 %v4451_v10 }
 0x479   :  { %1092 = vmatprep.subr.bf16.mxu0 %v4454_v11  ;;  %1133 = vmatprep.subr.bf16.mxu1 %v4509_v43 }
 0x47c   :  { %1093 = vmatpush1.bf16.msra.mxu0 %v4458_v14  ;;  %1134 = vmatpush1.bf16.msra.mxu1 %v4513_v60 }
 0x47d   :  { %1094 = vmatprep.subr.bf16.mxu0 %v4462_v15  ;;  %1135 = vmatprep.subr.bf16.mxu1 %v4517_v47 }
 0x480   :  { %1095 = vmatpush1.bf16.msra.mxu0 %v4466_v16  ;;  %1136 = vmatpush1.bf16.msra.mxu1 %v4521_v49 }
 0x481   :  { %1096 = vmatprep.subr.bf16.mxu0 %v4470_v17  ;;  %1137 = vmatprep.subr.bf16.mxu1 %v4525_v52 }
 0x484   :  { %1097 = vmatpush1.bf16.msra.mxu0 %v4528_v55  ;;  %1138 = vmatpush1.bf16.msra.mxu1 %v4531_v51 }
 0x485   :  { %1098 = vmatprep.subr.bf16.mxu0 %v4534_v2  ;;  %1139 = vmatprep.subr.bf16.mxu1 %v4537_v58 }
 0x488   :  { %1099 = vmatpush1.bf16.msra.mxu0 %v4540_v42  ;;  %1140 = vmatpush1.bf16.msra.mxu1 %v4543_v3 }
 0x489   :  { %1100 = vmatprep.subr.bf16.mxu0 %v4546_v27  ;;  %1141 = vmatprep.subr.bf16.mxu1 %v4549_v28 }
 0x48c   :  { %1101 = vmatpush1.bf16.msra.mxu0 %v4552_v29  ;;  %1142 = vmatpush1.bf16.msra.mxu1 %v4555_v30 }
 0x48d   :  { %1198 = vmatprep.subr.bf16.mxu0 %v4410_v8  ;;  %1239 = vmatprep.subr.bf16.mxu1 %v4485_v26 }
 0x542   :  { %v1008_v56 = vpop.f32.mrb[32].mxu0  ;;  %v1049_v33 = vpop.f32.mrb[40].mxu1 }
 0x543   :  { %v1056_v35 = vadd.f32 %v1008_v56, %v4859_v34  ;;  %v1058_v37 = vadd.f32 %v1049_v33, %v4860_v36  ;;  %v1010_v38 = vpop.f32.mrb[33].mxu0  ;;  %v1051_v39 = vpop.f32.mrb[41].mxu1 }
 0x544   :  { %v1057_v41 = vadd.f32 %v1010_v38, %v4861_v40  ;;  %v1059_v19 = vadd.f32 %v1051_v39, %v4862_v18  ;;  %v1012_v20 = vpop.f32.mrb[34].mxu0  ;;  %v1053_v4 = vpop.f32.mrb[42].mxu1  ;;  %v4863_v38 = vld [vmem:[#allocation17_spill] sm:$0xff]  ;;  %v4864_v40 = vld [vmem:[#allocation24_spill] sm:$0xff] }
 0x545   :  { %v3110_v1 = vmul.f32 -1.442695, %v1056_v35  ;;  %v1013_v12 = vpop.f32.mrb[35].mxu0  ;;  %v1054_v21 = vpop.f32.mrb[43].mxu1  ;;  %v4865_v20 = vld [vmem:[#allocation18_spill] sm:$0xff] }
 0x546   :  { %v3111_v50 = vmul.f32 -1.442695, %v1057_v41  ;;  %v3112_v0 = vmul.f32 -1.442695, %v1059_v19 }
 0x547   :  { %3754 = vpow2.f32 %v3110_v1  ;;  %v4866_v1 = vld [vmem:[#allocation26_spill] sm:$0xff] }
 0x548   :  { %3756 = vpow2.f32 %v3111_v50 }
 0x549   :  { %3758 = vpow2.f32 %v3112_v0 }
 0x54a   :  { %3760 = vtanh.f32 %v1058_v37 }
 0x551   :  { %v3755_v59 = vpop.eup %3754 }
 0x552   :  { %v3757_v46 = vpop.eup %3756  ;;  %v1063_v62 = vadd.f32 1.0, %v3755_v59 }
 0x553   :  { %v1069_v23 = vadd.f32 1.0, %v3757_v46  ;;  %v3759_v24 = vpop.eup %3758 }
 0x554   :  { %3762 = vrcp.f32 %v1063_v62  ;;  %v3761_v25 = vpop.eup %3760  ;;  %v1076_v61 = vadd.f32 1.0, %v3759_v24 }
 0x555   :  { %3764 = vrcp.f32 %v1069_v23 }
 0x556   :  { %3766 = vrcp.f32 %v1076_v61 }
 0x55e   :  { %v3763_v13 = vpop.eup %3762 }
 0x55f   :  { %v3765_v57 = vpop.eup %3764  ;;  %v1080_v53 = vmul.f32 %v3763_v13, %v3761_v25 }
 0x560   :  { %v1079_v32 = vmul.f32 %v3765_v57, %v4565_v48  ;;  %v3767_v33 = vpop.eup %3766 }
 0x562   :  { %v4607_v56 = vadd.f32 %v1080_v53, %v1079_v32 }
 0x564   :  { %3768 = vtanh.f32 %v4607_v56 }
 0x56e   :  { %v3769_v34 = vpop.eup %3768 }
 0x56f   :  { %v1083_v35 = vmul.f32 %v3769_v34, %v3767_v33 }
 0x571   :  { %v1084_v36 = vpack.c.bf16 %v1083_v35, %v1083_v35 }
 0x573   :  { %1085 = vst [vmem:[#allocation2 + $0x10] sm:$0xf] %v1084_v36  ;;  %1119 = vmatmul.mubr.bf16.vlgmr.msra.gmra.mrb[36].mxu0 %v1084_v36  ;;  %1160 = vmatmul.mubr.bf16.vlgmr.msra.gmra.mrb[44].mxu1 %v1084_v36 }
 0x574   :  { %1199 = vmatpush1.bf16.msra.mxu0 %v4422_v5  ;;  %1240 = vmatpush1.bf16.msra.mxu1 %v4425_v7 }
 0x575   :  { %1200 = vmatprep.subr.bf16.mxu0 %v4428_v63  ;;  %1241 = vmatprep.subr.bf16.mxu1 %v4431_v22 }
 0x576   :  { %1230 = vmatprep.mubr.bf16.mxu0 %v4858_v54  ;;  %1271 = vmatprep.mubr.bf16.mxu1 %v4858_v54 }
 0x578   :  { %1201 = vmatpush1.bf16.msra.mxu0 %v4436_v44  ;;  %1242 = vmatpush1.bf16.msra.mxu1 %v4439_v45 }
 0x579   :  { %1202 = vmatprep.subr.bf16.mxu0 %v4442_v31  ;;  %1243 = vmatprep.subr.bf16.mxu1 %v4445_v6 }
 0x57c   :  { %1203 = vmatpush1.bf16.msra.mxu0 %v4448_v9  ;;  %1244 = vmatpush1.bf16.msra.mxu1 %v4451_v10 }
 0x57d   :  { %1204 = vmatprep.subr.bf16.mxu0 %v4454_v11  ;;  %1245 = vmatprep.subr.bf16.mxu1 %v4509_v43 }
 0x580   :  { %1205 = vmatpush1.bf16.msra.mxu0 %v4458_v14  ;;  %1246 = vmatpush1.bf16.msra.mxu1 %v4513_v60 }
 0x581   :  { %1206 = vmatprep.subr.bf16.mxu0 %v4462_v15  ;;  %1247 = vmatprep.subr.bf16.mxu1 %v4517_v47 }
 0x584   :  { %1207 = vmatpush1.bf16.msra.mxu0 %v4466_v16  ;;  %1248 = vmatpush1.bf16.msra.mxu1 %v4521_v49 }
 0x585   :  { %1208 = vmatprep.subr.bf16.mxu0 %v4470_v17  ;;  %1249 = vmatprep.subr.bf16.mxu1 %v4525_v52 }
 0x588   :  { %1209 = vmatpush1.bf16.msra.mxu0 %v4528_v55  ;;  %1250 = vmatpush1.bf16.msra.mxu1 %v4531_v51 }
 0x589   :  { %1210 = vmatprep.subr.bf16.mxu0 %v4534_v2  ;;  %1251 = vmatprep.subr.bf16.mxu1 %v4537_v58 }
 0x58c   :  { %1211 = vmatpush1.bf16.msra.mxu0 %v4540_v42  ;;  %1252 = vmatpush1.bf16.msra.mxu1 %v4543_v3 }
 0x58d   :  { %1212 = vmatprep.subr.bf16.mxu0 %v4546_v27  ;;  %1253 = vmatprep.subr.bf16.mxu1 %v4549_v28 }
 0x590   :  { %1213 = vmatpush1.bf16.msra.mxu0 %v4552_v29  ;;  %1254 = vmatpush1.bf16.msra.mxu1 %v4555_v30 }
 0x591   :  { %1310 = vmatprep.subr.bf16.mxu0 %v4410_v8  ;;  %1351 = vmatprep.subr.bf16.mxu1 %v4485_v26 }
 0x646   :  { %v1120_v48 = vpop.f32.mrb[36].mxu0  ;;  %v1161_v37 = vpop.f32.mrb[44].mxu1 }
 0x647   :  { %v1168_v39 = vadd.f32 %v1120_v48, %v4863_v38  ;;  %v1170_v41 = vadd.f32 %v1161_v37, %v4864_v40  ;;  %v1122_v18 = vpop.f32.mrb[37].mxu0  ;;  %v1163_v19 = vpop.f32.mrb[45].mxu1 }
 0x648   :  { %v1169_v4 = vadd.f32 %v1122_v18, %v4865_v20  ;;  %v1171_v12 = vadd.f32 %v1163_v19, %v4866_v1  ;;  %v1124_v21 = vpop.f32.mrb[38].mxu0  ;;  %v1165_v50 = vpop.f32.mrb[46].mxu1  ;;  %v4867_v18 = vld [vmem:[#allocation19_spill] sm:$0xff] }
 0x649   :  { %v3113_v0 = vmul.f32 -1.442695, %v1168_v39  ;;  %v1125_v59 = vpop.f32.mrb[39].mxu0  ;;  %v1166_v46 = vpop.f32.mrb[47].mxu1  ;;  %v4868_v20 = vld [vmem:[#allocation27_spill] sm:$0xff]  ;;  %v4869_v21 = vld [vmem:[#allocation21_spill] sm:$0xff] }
 0x64a   :  { %v3114_v62 = vmul.f32 -1.442695, %v1169_v4  ;;  %v3115_v23 = vmul.f32 -1.442695, %v1171_v12 }
 0x64b   :  { %3770 = vpow2.f32 %v3113_v0  ;;  %v4870_v0 = vld [vmem:[#allocation28_spill] sm:$0xff] }
 0x64c   :  { %3772 = vpow2.f32 %v3114_v62 }
 0x64d   :  { %3774 = vpow2.f32 %v3115_v23 }
 0x64e   :  { %3776 = vtanh.f32 %v1170_v41 }
 0x655   :  { %v3771_v24 = vpop.eup %3770 }
 0x656   :  { %v3773_v25 = vpop.eup %3772  ;;  %v1175_v13 = vadd.f32 1.0, %v3771_v24 }
 0x657   :  { %v1181_v57 = vadd.f32 1.0, %v3773_v25  ;;  %v3775_v53 = vpop.eup %3774 }
 0x658   :  { %3778 = vrcp.f32 %v1175_v13  ;;  %v3777_v61 = vpop.eup %3776  ;;  %v1188_v35 = vadd.f32 1.0, %v3775_v53 }
 0x659   :  { %3780 = vrcp.f32 %v1181_v57 }
 0x65a   :  { %3782 = vrcp.f32 %v1188_v35 }
 0x662   :  { %v3779_v32 = vpop.eup %3778 }
 0x663   :  { %v3781_v33 = vpop.eup %3780  ;;  %v1192_v34 = vmul.f32 %v3779_v32, %v3777_v61 }
 0x664   :  { %v1191_v36 = vmul.f32 %v3781_v33, %v4607_v56  ;;  %v3783_v37 = vpop.eup %3782 }
 0x666   :  { %v4649_v48 = vadd.f32 %v1192_v34, %v1191_v36 }
 0x668   :  { %3784 = vtanh.f32 %v4649_v48 }
 0x672   :  { %v3785_v38 = vpop.eup %3784 }
 0x673   :  { %v1195_v39 = vmul.f32 %v3785_v38, %v3783_v37 }
 0x675   :  { %v1196_v40 = vpack.c.bf16 %v1195_v39, %v1195_v39 }
 0x677   :  { %1197 = vst [vmem:[#allocation2 + $0x14] sm:$0xf] %v1196_v40  ;;  %1231 = vmatmul.mubr.bf16.vlgmr.msra.gmra.mrb[40].mxu0 %v1196_v40  ;;  %1272 = vmatmul.mubr.bf16.vlgmr.msra.gmra.mrb[48].mxu1 %v1196_v40 }
 0x678   :  { %1311 = vmatpush1.bf16.msra.mxu0 %v4422_v5  ;;  %1352 = vmatpush1.bf16.msra.mxu1 %v4425_v7 }
 0x679   :  { %1312 = vmatprep.subr.bf16.mxu0 %v4428_v63  ;;  %1353 = vmatprep.subr.bf16.mxu1 %v4431_v22 }
 0x67a   :  { %1342 = vmatprep.mubr.bf16.mxu0 %v4858_v54  ;;  %1383 = vmatprep.mubr.bf16.mxu1 %v4858_v54 }
 0x67c   :  { %1313 = vmatpush1.bf16.msra.mxu0 %v4436_v44  ;;  %1354 = vmatpush1.bf16.msra.mxu1 %v4439_v45 }
 0x67d   :  { %1314 = vmatprep.subr.bf16.mxu0 %v4442_v31  ;;  %1355 = vmatprep.subr.bf16.mxu1 %v4445_v6 }
 0x680   :  { %1315 = vmatpush1.bf16.msra.mxu0 %v4448_v9  ;;  %1356 = vmatpush1.bf16.msra.mxu1 %v4451_v10 }
 0x681   :  { %1316 = vmatprep.subr.bf16.mxu0 %v4454_v11  ;;  %1357 = vmatprep.subr.bf16.mxu1 %v4509_v43 }
 0x684   :  { %1317 = vmatpush1.bf16.msra.mxu0 %v4458_v14  ;;  %1358 = vmatpush1.bf16.msra.mxu1 %v4513_v60 }
 0x685   :  { %1318 = vmatprep.subr.bf16.mxu0 %v4462_v15  ;;  %1359 = vmatprep.subr.bf16.mxu1 %v4517_v47 }
 0x688   :  { %1319 = vmatpush1.bf16.msra.mxu0 %v4466_v16  ;;  %1360 = vmatpush1.bf16.msra.mxu1 %v4521_v49 }
 0x689   :  { %1320 = vmatprep.subr.bf16.mxu0 %v4470_v17  ;;  %1361 = vmatprep.subr.bf16.mxu1 %v4525_v52 }
 0x68c   :  { %1321 = vmatpush1.bf16.msra.mxu0 %v4528_v55  ;;  %1362 = vmatpush1.bf16.msra.mxu1 %v4531_v51 }
 0x68d   :  { %1322 = vmatprep.subr.bf16.mxu0 %v4534_v2  ;;  %1363 = vmatprep.subr.bf16.mxu1 %v4537_v58 }
 0x690   :  { %1323 = vmatpush1.bf16.msra.mxu0 %v4540_v42  ;;  %1364 = vmatpush1.bf16.msra.mxu1 %v4543_v3 }
 0x691   :  { %1324 = vmatprep.subr.bf16.mxu0 %v4546_v27  ;;  %1365 = vmatprep.subr.bf16.mxu1 %v4549_v28 }
 0x694   :  { %1325 = vmatpush1.bf16.msra.mxu0 %v4552_v29  ;;  %1366 = vmatpush1.bf16.msra.mxu1 %v4555_v30 }
 0x695   :  { %1422 = vmatprep.subr.bf16.mxu0 %v4410_v8  ;;  %1463 = vmatprep.subr.bf16.mxu1 %v4485_v26 }
 0x74a   :  { %v1232_v56 = vpop.f32.mrb[40].mxu0  ;;  %v1273_v41 = vpop.f32.mrb[48].mxu1 }
 0x74b   :  { %v1280_v19 = vadd.f32 %v1232_v56, %v4867_v18  ;;  %v1282_v4 = vadd.f32 %v1273_v41, %v4868_v20  ;;  %v1234_v1 = vpop.f32.mrb[41].mxu0  ;;  %v1275_v12 = vpop.f32.mrb[49].mxu1 }
 0x74c   :  { %v1281_v50 = vadd.f32 %v1234_v1, %v4869_v21  ;;  %v1283_v59 = vadd.f32 %v1275_v12, %v4870_v0  ;;  %v1236_v46 = vpop.f32.mrb[42].mxu0  ;;  %v1277_v62 = vpop.f32.mrb[50].mxu1  ;;  %v4871_v1 = vld [vmem:[#allocation23_spill] sm:$0xff]  ;;  %v4872_v21 = vld [vmem:[#allocation29_spill] sm:$0xff] }
 0x74d   :  { %v3116_v23 = vmul.f32 -1.442695, %v1280_v19  ;;  %v1237_v24 = vpop.f32.mrb[43].mxu0  ;;  %v1278_v25 = vpop.f32.mrb[51].mxu1  ;;  %v4873_v46 = vld [vmem:[#allocation25_spill] sm:$0xff] }
 0x74e   :  { %v3117_v13 = vmul.f32 -1.442695, %v1281_v50  ;;  %v3118_v57 = vmul.f32 -1.442695, %v1283_v59 }
 0x74f   :  { %3786 = vpow2.f32 %v3116_v23  ;;  %v4874_v23 = vld [vmem:[#allocation30_spill] sm:$0xff] }
 0x750   :  { %3788 = vpow2.f32 %v3117_v13 }
 0x751   :  { %3790 = vpow2.f32 %v3118_v57 }
 0x752   :  { %3792 = vtanh.f32 %v1282_v4 }
 0x759   :  { %v3787_v53 = vpop.eup %3786 }
 0x75a   :  { %v3789_v61 = vpop.eup %3788  ;;  %v1287_v32 = vadd.f32 1.0, %v3787_v53 }
 0x75b   :  { %v1293_v33 = vadd.f32 1.0, %v3789_v61  ;;  %v3791_v34 = vpop.eup %3790 }
 0x75c   :  { %3794 = vrcp.f32 %v1287_v32  ;;  %v3793_v35 = vpop.eup %3792  ;;  %v1300_v39 = vadd.f32 1.0, %v3791_v34 }
 0x75d   :  { %3796 = vrcp.f32 %v1293_v33 }
 0x75e   :  { %3798 = vrcp.f32 %v1300_v39 }
 0x766   :  { %v3795_v36 = vpop.eup %3794 }
 0x767   :  { %v3797_v37 = vpop.eup %3796  ;;  %v1304_v38 = vmul.f32 %v3795_v36, %v3793_v35 }
 0x768   :  { %v1303_v40 = vmul.f32 %v3797_v37, %v4649_v48  ;;  %v3799_v41 = vpop.eup %3798 }
 0x76a   :  { %v4691_v56 = vadd.f32 %v1304_v38, %v1303_v40 }
 0x76c   :  { %3800 = vtanh.f32 %v4691_v56 }
 0x776   :  { %v3801_v18 = vpop.eup %3800 }
 0x777   :  { %v1307_v19 = vmul.f32 %v3801_v18, %v3799_v41 }
 0x779   :  { %v1308_v20 = vpack.c.bf16 %v1307_v19, %v1307_v19 }
 0x77b   :  { %1309 = vst [vmem:[#allocation2 + $0x18] sm:$0xf] %v1308_v20  ;;  %1343 = vmatmul.mubr.bf16.vlgmr.msra.gmra.mrb[44].mxu0 %v1308_v20  ;;  %1384 = vmatmul.mubr.bf16.vlgmr.msra.gmra.mrb[52].mxu1 %v1308_v20 }
 0x77c   :  { %1423 = vmatpush1.bf16.msra.mxu0 %v4422_v5  ;;  %1464 = vmatpush1.bf16.msra.mxu1 %v4425_v7 }
 0x77d   :  { %1424 = vmatprep.subr.bf16.mxu0 %v4428_v63  ;;  %1465 = vmatprep.subr.bf16.mxu1 %v4431_v22 }
 0x77e   :  { %1454 = vmatprep.mubr.bf16.mxu0 %v4858_v54  ;;  %1495 = vmatprep.mubr.bf16.mxu1 %v4858_v54 }
 0x780   :  { %1425 = vmatpush1.bf16.msra.mxu0 %v4436_v44  ;;  %1466 = vmatpush1.bf16.msra.mxu1 %v4439_v45 }
 0x781   :  { %1426 = vmatprep.subr.bf16.mxu0 %v4442_v31  ;;  %1467 = vmatprep.subr.bf16.mxu1 %v4445_v6 }
 0x784   :  { %1427 = vmatpush1.bf16.msra.mxu0 %v4448_v9  ;;  %1468 = vmatpush1.bf16.msra.mxu1 %v4451_v10 }
 0x785   :  { %1428 = vmatprep.subr.bf16.mxu0 %v4454_v11  ;;  %1469 = vmatprep.subr.bf16.mxu1 %v4509_v43 }
 0x788   :  { %1429 = vmatpush1.bf16.msra.mxu0 %v4458_v14  ;;  %1470 = vmatpush1.bf16.msra.mxu1 %v4513_v60 }
 0x789   :  { %1430 = vmatprep.subr.bf16.mxu0 %v4462_v15  ;;  %1471 = vmatprep.subr.bf16.mxu1 %v4517_v47 }
 0x78c   :  { %1431 = vmatpush1.bf16.msra.mxu0 %v4466_v16  ;;  %1472 = vmatpush1.bf16.msra.mxu1 %v4521_v49 }
 0x78d   :  { %1432 = vmatprep.subr.bf16.mxu0 %v4470_v17  ;;  %1473 = vmatprep.subr.bf16.mxu1 %v4525_v52 }
 0x790   :  { %1433 = vmatpush1.bf16.msra.mxu0 %v4528_v55  ;;  %1474 = vmatpush1.bf16.msra.mxu1 %v4531_v51 }
 0x791   :  { %1434 = vmatprep.subr.bf16.mxu0 %v4534_v2  ;;  %1475 = vmatprep.subr.bf16.mxu1 %v4537_v58 }
 0x794   :  { %1435 = vmatpush1.bf16.msra.mxu0 %v4540_v42  ;;  %1476 = vmatpush1.bf16.msra.mxu1 %v4543_v3 }
 0x795   :  { %1436 = vmatprep.subr.bf16.mxu0 %v4546_v27  ;;  %1477 = vmatprep.subr.bf16.mxu1 %v4549_v28 }
 0x798   :  { %1437 = vmatpush1.bf16.msra.mxu0 %v4552_v29  ;;  %1478 = vmatpush1.bf16.msra.mxu1 %v4555_v30 }
 0x799   :  { %1534 = vmatprep.subr.bf16.mxu0 %v4410_v8  ;;  %1575 = vmatprep.subr.bf16.mxu1 %v4485_v26 }
 0x84e   :  { %v1344_v48 = vpop.f32.mrb[44].mxu0  ;;  %v1385_v4 = vpop.f32.mrb[52].mxu1 }
 0x84f   :  { %v1392_v12 = vadd.f32 %v1344_v48, %v4871_v1  ;;  %v1394_v50 = vadd.f32 %v1385_v4, %v4872_v21  ;;  %v1346_v0 = vpop.f32.mrb[45].mxu0  ;;  %v1387_v59 = vpop.f32.mrb[53].mxu1 }
 0x850   :  { %v1393_v62 = vadd.f32 %v1346_v0, %v4873_v46  ;;  %v1395_v24 = vadd.f32 %v1387_v59, %v4874_v23  ;;  %v1348_v25 = vpop.f32.mrb[46].mxu0  ;;  %v1389_v13 = vpop.f32.mrb[54].mxu1  ;;  %v4776_v59 = vld [vmem:[#allocation2] sm:$0xff]  ;;  %v3424_v46 = vld [vmem:[#allocation5] ss:$8 sps:$4 sm:$0xff]  }
 0x851   :  { %v3119_v57 = vmul.f32 -1.442695, %v1392_v12  ;;  %v1349_v53 = vpop.f32.mrb[47].mxu0  ;;  %v1390_v61 = vpop.f32.mrb[55].mxu1  ;;  %v4778_v23 = vld [vmem:[#allocation2 + $0x10] sm:$0xff] }
 0x852   :  { %v3120_v8 = vmul.f32 -1.442695, %v1393_v62  ;;  %v3121_v26 = vmul.f32 -1.442695, %v1395_v24  ;;  %v3427_v62 = vld [vmem:[#allocation5 + $0x200] ss:$8 sps:$4 sm:$0xff]   ;;  %v3133_v53 = vcombine.high %v4778_v23, %v4778_v23 }
 0x853   :  { %3802 = vpow2.f32 %v3119_v57  ;;  %v3436_v25 = vld [vmem:[#allocation5 + $0x14] ss:$8 sps:$4 sm:$0xff]   ;;  %v3129_v57 = vcombine.high %v4776_v59, %v4776_v59  ;;  %v3434_v61 = vld [vmem:[#allocation5 + $0x10] ss:$8 sps:$4 sm:$0xff]  }
 0x854   :  { %3804 = vpow2.f32 %v3120_v8  ;;  %v3439_v13 = vld [vmem:[#allocation5 + $0x214] ss:$8 sps:$4 sm:$0xff]   ;;  %v3437_v8 = vld [vmem:[#allocation5 + $0x210] ss:$8 sps:$4 sm:$0xff]  }
 0x855   :  { %3806 = vpow2.f32 %v3121_v26  ;;  %v3442_v26 = vld [vmem:[#allocation5 + $0x24] ss:$8 sps:$4 sm:$0xff]  }
 0x856   :  { %3808 = vtanh.f32 %v1394_v50 }
 0x85d   :  { %v3803_v32 = vpop.eup %3802 }
 0x85e   :  { %v3805_v33 = vpop.eup %3804  ;;  %v1399_v34 = vadd.f32 1.0, %v3803_v32  ;;  %v3445_v32 = vld [vmem:[#allocation5 + $0x224] ss:$8 sps:$4 sm:$0xff]  }
 0x85f   :  { %v1405_v35 = vadd.f32 1.0, %v3805_v33  ;;  %v3807_v36 = vpop.eup %3806  ;;  %v3440_v33 = vld [vmem:[#allocation5 + $0x20] ss:$8 sps:$4 sm:$0xff]  }
 0x860   :  { %3810 = vrcp.f32 %v1399_v34  ;;  %v3809_v37 = vpop.eup %3808  ;;  %v1412_v41 = vadd.f32 1.0, %v3807_v36  ;;  %v3443_v34 = vld [vmem:[#allocation5 + $0x220] ss:$8 sps:$4 sm:$0xff]   ;;  %v3451_v36 = vld [vmem:[#allocation5 + $0x234] ss:$8 sps:$4 sm:$0xff]  }
 0x861   :  { %3812 = vrcp.f32 %v1405_v35  ;;  %v3448_v35 = vld [vmem:[#allocation5 + $0x34] ss:$8 sps:$4 sm:$0xff]  }
 0x862   :  { %3814 = vrcp.f32 %v1412_v41  ;;  %v3452_v41 = vld [vmem:[#allocation5 + $0x40] ss:$8 sps:$4 sm:$0xff]  }
 0x86a   :  { %v3811_v38 = vpop.eup %3810 }
 0x86b   :  { %v3813_v39 = vpop.eup %3812  ;;  %v1416_v40 = vmul.f32 %v3811_v38, %v3809_v37  ;;  %v3446_v37 = vld [vmem:[#allocation5 + $0x30] ss:$8 sps:$4 sm:$0xff]  }
 0x86c   :  { %v1415_v18 = vmul.f32 %v3813_v39, %v4691_v56  ;;  %v3815_v20 = vpop.eup %3814  ;;  %v3449_v38 = vld [vmem:[#allocation5 + $0x230] ss:$8 sps:$4 sm:$0xff]   ;;  %v3454_v39 = vld [vmem:[#allocation5 + $0x44] ss:$8 sps:$4 sm:$0xff]  }
 0x86e   :  { %v4733_v19 = vadd.f32 %v1416_v40, %v1415_v18  ;;  %v3457_v40 = vld [vmem:[#allocation5 + $0x244] ss:$8 sps:$4 sm:$0xff]   ;;  %v3455_v18 = vld [vmem:[#allocation5 + $0x240] ss:$8 sps:$4 sm:$0xff]  }
 0x870   :  { %3816 = vtanh.f32 %v4733_v19 }
 0x87a   :  { %v3817_v48 = vpop.eup %3816 }
 0x87b   :  { %v1419_v4 = vmul.f32 %v3817_v48, %v3815_v20  ;;  %v3463_v20 = vld [vmem:[#allocation5 + $0x254] ss:$8 sps:$4 sm:$0xff]   ;;  %v3458_v48 = vld [vmem:[#allocation5 + $0x50] ss:$8 sps:$4 sm:$0xff]  }
 0x87d   :  { %v1420_v1 = vpack.c.bf16 %v1419_v4, %v1419_v4  ;;  %v3461_v4 = vld [vmem:[#allocation5 + $0x250] ss:$8 sps:$4 sm:$0xff]  }
 0x87f   :  { %1421 = vst [vmem:[#allocation2 + $0x1c] sm:$0xf] %v1420_v1  ;;  %1455 = vmatmul.mubr.bf16.vlgmr.msra.gmra.mrb[48].mxu0 %v1420_v1  ;;  %1496 = vmatmul.mubr.bf16.vlgmr.msra.gmra.mrb[56].mxu1 %v1420_v1  ;;  %v3466_v1 = vld [vmem:[#allocation5 + $0x64] ss:$8 sps:$4 sm:$0xff]  }
 0x880   :  { %1535 = vmatpush1.bf16.msra.mxu0 %v4422_v5  ;;  %1576 = vmatpush1.bf16.msra.mxu1 %v4425_v7  ;;  %v3429_v5 = vld [vmem:[#allocation5 + $0x204] ss:$8 sps:$4 sm:$0xff]  }
 0x881   :  { %1536 = vmatprep.subr.bf16.mxu0 %v4428_v63  ;;  %1577 = vmatprep.subr.bf16.mxu1 %v4431_v22  ;;  %v4875_v22 = vld [vmem:[#allocation11_spill] sm:$0xff] }
 0x882   :  { %1566 = vmatprep.mubr.bf16.mxu0 %v4858_v54  ;;  %1607 = vmatprep.mubr.bf16.mxu1 %v4858_v54  ;;  %v3426_v54 = vld [vmem:[#allocation5 + $0x4] ss:$8 sps:$4 sm:$0xff]  }
 0x884   :  { %1537 = vmatpush1.bf16.msra.mxu0 %v4436_v44  ;;  %1578 = vmatpush1.bf16.msra.mxu1 %v4439_v45  ;;  %v4876_v45 = vld [vmem:[#allocation31_spill] sm:$0xff] }
 0x885   :  { %1538 = vmatprep.subr.bf16.mxu0 %v4442_v31  ;;  %1579 = vmatprep.subr.bf16.mxu1 %v4445_v6 }
 0x888   :  { %1539 = vmatpush1.bf16.msra.mxu0 %v4448_v9  ;;  %1580 = vmatpush1.bf16.msra.mxu1 %v4451_v10  ;;  %v4877_v10 = vld [vmem:[#allocation12_spill] sm:$0xff] }
 0x889   :  { %1540 = vmatprep.subr.bf16.mxu0 %v4454_v11  ;;  %1581 = vmatprep.subr.bf16.mxu1 %v4509_v43 }
 0x88c   :  { %1541 = vmatpush1.bf16.msra.mxu0 %v4458_v14  ;;  %1582 = vmatpush1.bf16.msra.mxu1 %v4513_v60  ;;  %v4878_v14 = vld [vmem:[#allocation32_spill] sm:$0xff] }
 0x88d   :  { %1542 = vmatprep.subr.bf16.mxu0 %v4462_v15  ;;  %1583 = vmatprep.subr.bf16.mxu1 %v4517_v47 }
 0x890   :  { %1543 = vmatpush1.bf16.msra.mxu0 %v4466_v16  ;;  %1584 = vmatpush1.bf16.msra.mxu1 %v4521_v49 }
 0x891   :  { %1544 = vmatprep.subr.bf16.mxu0 %v4470_v17  ;;  %1585 = vmatprep.subr.bf16.mxu1 %v4525_v52 }
 0x894   :  { %1545 = vmatpush1.bf16.msra.mxu0 %v4528_v55  ;;  %1586 = vmatpush1.bf16.msra.mxu1 %v4531_v51 }
 0x895   :  { %1546 = vmatprep.subr.bf16.mxu0 %v4534_v2  ;;  %1587 = vmatprep.subr.bf16.mxu1 %v4537_v58 }
 0x898   :  { %1547 = vmatpush1.bf16.msra.mxu0 %v4540_v42  ;;  %1588 = vmatpush1.bf16.msra.mxu1 %v4543_v3 }
 0x899   :  { %1548 = vmatprep.subr.bf16.mxu0 %v4546_v27  ;;  %1589 = vmatprep.subr.bf16.mxu1 %v4549_v28 }
 0x89c   :  { %1549 = vmatpush1.bf16.msra.mxu0 %v4552_v29  ;;  %1590 = vmatpush1.bf16.msra.mxu1 %v4555_v30 }
 0x89d   :  { %2658 = vmatprep.subr.bf16.mxu1 %v3426_v54  ;;  %2740 = vmatprep.subr.bf16.mxu0 %v3429_v5  ;;  %v3469_v54 = vld [vmem:[#allocation5 + $0x264] ss:$8 sps:$4 sm:$0xff]   ;;  %v3464_v5 = vld [vmem:[#allocation5 + $0x60] ss:$8 sps:$4 sm:$0xff]  }
 0x952   :  { %v1456_v7 = vpop.f32.mrb[48].mxu0  ;;  %v1497_v63 = vpop.f32.mrb[56].mxu1 }
 0x953   :  { %v1504_v44 = vadd.f32 %v1456_v7, %v4875_v22  ;;  %v1506_v31 = vadd.f32 %v1497_v63, %v4876_v45  ;;  %v1458_v6 = vpop.f32.mrb[49].mxu0  ;;  %v1499_v9 = vpop.f32.mrb[57].mxu1  ;;  %v3467_v7 = vld [vmem:[#allocation5 + $0x260] ss:$8 sps:$4 sm:$0xff]   ;;  %v3472_v63 = vld [vmem:[#allocation5 + $0x74] ss:$8 sps:$4 sm:$0xff]  }
 0x954   :  { %v1505_v11 = vadd.f32 %v1458_v6, %v4877_v10  ;;  %v1507_v15 = vadd.f32 %v1499_v9, %v4878_v14  ;;  %v1460_v16 = vpop.f32.mrb[50].mxu0  ;;  %v1501_v17 = vpop.f32.mrb[58].mxu1  ;;  %v3475_v22 = vld [vmem:[#allocation5 + $0x274] ss:$8 sps:$4 sm:$0xff]   ;;  %v3473_v45 = vld [vmem:[#allocation5 + $0x270] ss:$8 sps:$4 sm:$0xff]  }
 0x955   :  { %v3122_v43 = vmul.f32 -1.442695, %v1504_v44  ;;  %v1461_v60 = vpop.f32.mrb[51].mxu0  ;;  %v1502_v47 = vpop.f32.mrb[59].mxu1  ;;  %v3470_v44 = vld [vmem:[#allocation5 + $0x70] ss:$8 sps:$4 sm:$0xff]  }
 0x956   :  { %v3123_v49 = vmul.f32 -1.442695, %v1505_v11  ;;  %v3124_v52 = vmul.f32 -1.442695, %v1507_v15  ;;  %v3481_v6 = vld [vmem:[#allocation5 + $0x284] ss:$8 sps:$4 sm:$0xff]  }
 0x957   :  { %3818 = vpow2.f32 %v3122_v43  ;;  %v3476_v9 = vld [vmem:[#allocation5 + $0x80] ss:$8 sps:$4 sm:$0xff]   ;;  %v3484_v11 = vld [vmem:[#allocation5 + $0x94] ss:$8 sps:$4 sm:$0xff]   ;;  %v3482_v15 = vld [vmem:[#allocation5 + $0x90] ss:$8 sps:$4 sm:$0xff]  }
 0x958   :  { %3820 = vpow2.f32 %v3123_v49  ;;  %v3479_v10 = vld [vmem:[#allocation5 + $0x280] ss:$8 sps:$4 sm:$0xff]   ;;  %v3487_v14 = vld [vmem:[#allocation5 + $0x294] ss:$8 sps:$4 sm:$0xff]   ;;  %v3485_v16 = vld [vmem:[#allocation5 + $0x290] ss:$8 sps:$4 sm:$0xff]  }
 0x959   :  { %3822 = vpow2.f32 %v3124_v52  ;;  %v3490_v17 = vld [vmem:[#allocation5 + $0xa4] ss:$8 sps:$4 sm:$0xff]   ;;  %v3488_v60 = vld [vmem:[#allocation5 + $0xa0] ss:$8 sps:$4 sm:$0xff]   ;;  %v3496_v49 = vld [vmem:[#allocation5 + $0xb4] ss:$8 sps:$4 sm:$0xff]  }
 0x95a   :  { %3824 = vtanh.f32 %v1506_v31  ;;  %v3478_v31 = vld [vmem:[#allocation5 + $0x84] ss:$8 sps:$4 sm:$0xff]   ;;  %v3491_v47 = vld [vmem:[#allocation5 + $0x2a0] ss:$8 sps:$4 sm:$0xff]   ;;  %v3499_v52 = vld [vmem:[#allocation5 + $0x2b4] ss:$8 sps:$4 sm:$0xff]  }
 0x95b   :  { %v3493_v43 = vld [vmem:[#allocation5 + $0x2a4] ss:$8 sps:$4 sm:$0xff]  }
 0x961   :  { %v3819_v55 = vpop.eup %3818 }
 0x962   :  { %v3821_v51 = vpop.eup %3820  ;;  %v1511_v2 = vadd.f32 1.0, %v3819_v55  ;;  %v3494_v55 = vld [vmem:[#allocation5 + $0xb0] ss:$8 sps:$4 sm:$0xff]  }
 0x963   :  { %v1517_v58 = vadd.f32 1.0, %v3821_v51  ;;  %v3823_v42 = vpop.eup %3822  ;;  %v3497_v51 = vld [vmem:[#allocation5 + $0x2b0] ss:$8 sps:$4 sm:$0xff]  }
 0x964   :  { %3826 = vrcp.f32 %v1511_v2  ;;  %v3825_v3 = vpop.eup %3824  ;;  %v1524_v30 = vadd.f32 1.0, %v3823_v42  ;;  %v3502_v2 = vld [vmem:[#allocation5 + $0xc4] ss:$8 sps:$4 sm:$0xff]   ;;  %v3500_v42 = vld [vmem:[#allocation5 + $0xc0] ss:$8 sps:$4 sm:$0xff]  }
 0x965   :  { %3828 = vrcp.f32 %v1517_v58  ;;  %v3505_v58 = vld [vmem:[#allocation5 + $0x2c4] ss:$8 sps:$4 sm:$0xff]  }
 0x966   :  { %3830 = vrcp.f32 %v1524_v30  ;;  %v3509_v30 = vld [vmem:[#allocation5 + $0x2d0] ss:$8 sps:$4 sm:$0xff]  }
 0x96e   :  { %v3827_v27 = vpop.eup %3826 }
 0x96f   :  { %v3829_v28 = vpop.eup %3828  ;;  %v1528_v29 = vmul.f32 %v3827_v27, %v3825_v3  ;;  %v3503_v3 = vld [vmem:[#allocation5 + $0x2c0] ss:$8 sps:$4 sm:$0xff]   ;;  %v3508_v27 = vld [vmem:[#allocation5 + $0xd4] ss:$8 sps:$4 sm:$0xff]  }
 0x970   :  { %v1527_v56 = vmul.f32 %v3829_v28, %v4733_v19  ;;  %v3831_v21 = vpop.eup %3830  ;;  %v3460_v19 = vld [vmem:[#allocation5 + $0x54] ss:$8 sps:$4 sm:$0xff]  }
 0x971   :  { %v3511_v28 = vld [vmem:[#allocation5 + $0x2d4] ss:$8 sps:$4 sm:$0xff]  }
 0x972   :  { %v4773_v12 = vadd.f32 %v1528_v29, %v1527_v56  ;;  %v3506_v29 = vld [vmem:[#allocation5 + $0xd0] ss:$8 sps:$4 sm:$0xff]   ;;  %v3514_v56 = vld [vmem:[#allocation5 + $0xe4] ss:$8 sps:$4 sm:$0xff]  }
 0x974   :  { %3832 = vtanh.f32 %v4773_v12 }
 0x97e   :  { %v3833_v50 = vpop.eup %3832 }
 0x97f   :  { %v1531_v0 = vmul.f32 %v3833_v50, %v3831_v21  ;;  %v3517_v21 = vld [vmem:[#allocation5 + $0x2e4] ss:$8 sps:$4 sm:$0xff]   ;;  %v3512_v50 = vld [vmem:[#allocation5 + $0xe0] ss:$8 sps:$4 sm:$0xff]  }
 0x981   :  { %v1532_v24 = vpack.c.bf16 %v1531_v0, %v1531_v0  ;;  %v3515_v0 = vld [vmem:[#allocation5 + $0x2e0] ss:$8 sps:$4 sm:$0xff]  }
 0x983   :  { %1533 = vst [vmem:[#allocation2 + $0x20] sm:$0xf] %v1532_v24  ;;  %1567 = vmatmul.mubr.bf16.vlgmr.msra.gmra.mrb[52].mxu0 %v1532_v24  ;;  %1608 = vmatmul.mubr.bf16.vlgmr.msra.gmra.mrb[60].mxu1 %v1532_v24  ;;  %v3518_v24 = vld [vmem:[#allocation5 + $0xf0] ss:$8 sps:$4 sm:$0xff]  }
 0x984   :  { %2659 = vmatpush1.bf16.msra.mxu1 %v3424_v46  ;;  %2741 = vmatpush1.bf16.msra.mxu0 %v3427_v62  ;;  %v3520_v46 = vld [vmem:[#allocation5 + $0xf4] ss:$8 sps:$4 sm:$0xff]  }
 0x985   :  { %2690 = vmatprep.mubr.bf16.mxu1 %v3129_v57  ;;  %2772 = vmatprep.mubr.bf16.mxu0 %v3133_v53  ;;  %v3523_v62 = vld [vmem:[#allocation5 + $0x2f4] ss:$8 sps:$4 sm:$0xff]   ;;  %v3529_v57 = vld [vmem:[#allocation5 + $0x304] ss:$8 sps:$4 sm:$0xff]  }
 0x986   :  { %2660 = vmatprep.subr.bf16.mxu1 %v3436_v25  ;;  %2742 = vmatprep.subr.bf16.mxu0 %v3439_v13  ;;  %v3521_v25 = vld [vmem:[#allocation5 + $0x2f0] ss:$8 sps:$4 sm:$0xff]   ;;  %v3526_v13 = vld [vmem:[#allocation5 + $0x104] ss:$8 sps:$4 sm:$0xff]  }
 0x987   :  { %v4784_v53 = vld [vmem:[#allocation2 + $0x8] sm:$0xff] }
 0x988   :  { %2661 = vmatpush1.bf16.msra.mxu1 %v3434_v61  ;;  %2743 = vmatpush1.bf16.msra.mxu0 %v3437_v8  ;;  %v3524_v61 = vld [vmem:[#allocation5 + $0x100] ss:$8 sps:$4 sm:$0xff]   ;;  %v4786_v8 = vld [vmem:[#allocation2 + $0x18] sm:$0xff] }
 0x989   :  { %2662 = vmatprep.subr.bf16.mxu1 %v3442_v26  ;;  %2744 = vmatprep.subr.bf16.mxu0 %v3445_v32  ;;  %v3128_v26 = vcombine.low %v4776_v59, %v4776_v59  ;;  %v3132_v32 = vcombine.low %v4778_v23, %v4778_v23  ;;  %v3537_v59 = vld [vmem:[#allocation5 + $0x310] ss:$8 sps:$4 sm:$0xff]   ;;  %v3542_v23 = vld [vmem:[#allocation5 + $0x124] ss:$8 sps:$4 sm:$0xff]  }
 0x98c   :  { %2663 = vmatpush1.bf16.msra.mxu1 %v3440_v33  ;;  %2745 = vmatpush1.bf16.msra.mxu0 %v3443_v34  ;;  %v3527_v33 = vld [vmem:[#allocation5 + $0x300] ss:$8 sps:$4 sm:$0xff]   ;;  %v3131_v34 = vcombine.high %v4784_v53, %v4784_v53 }
 0x98d   :  { %2664 = vmatprep.subr.bf16.mxu1 %v3448_v35  ;;  %2746 = vmatprep.subr.bf16.mxu0 %v3451_v36  ;;  %v3536_v35 = vld [vmem:[#allocation5 + $0x114] ss:$8 sps:$4 sm:$0xff]  }
 0x98e   :  { %v3539_v36 = vld [vmem:[#allocation5 + $0x314] ss:$8 sps:$4 sm:$0xff]  }
 0x990   :  { %2665 = vmatpush1.bf16.msra.mxu1 %v3446_v37  ;;  %2747 = vmatpush1.bf16.msra.mxu0 %v3449_v38  ;;  %v3135_v37 = vcombine.high %v4786_v8, %v4786_v8  ;;  %v3534_v38 = vld [vmem:[#allocation5 + $0x110] ss:$8 sps:$4 sm:$0xff]  }
 0x991   :  { %2666 = vmatprep.subr.bf16.mxu1 %v3454_v39  ;;  %2748 = vmatprep.subr.bf16.mxu0 %v3457_v40  ;;  %v3545_v39 = vld [vmem:[#allocation5 + $0x324] ss:$8 sps:$4 sm:$0xff]   ;;  %v3540_v40 = vld [vmem:[#allocation5 + $0x120] ss:$8 sps:$4 sm:$0xff]  }
 0x994   :  { %2667 = vmatpush1.bf16.msra.mxu1 %v3452_v41  ;;  %2749 = vmatpush1.bf16.msra.mxu0 %v3455_v18  ;;  %v3543_v41 = vld [vmem:[#allocation5 + $0x320] ss:$8 sps:$4 sm:$0xff]   ;;  %v3548_v18 = vld [vmem:[#allocation5 + $0x134] ss:$8 sps:$4 sm:$0xff]  }
 0x995   :  { %2668 = vmatprep.subr.bf16.mxu1 %v3460_v19  ;;  %2750 = vmatprep.subr.bf16.mxu0 %v3463_v20  ;;  %v3551_v19 = vld [vmem:[#allocation5 + $0x334] ss:$8 sps:$4 sm:$0xff]   ;;  %v3546_v20 = vld [vmem:[#allocation5 + $0x130] ss:$8 sps:$4 sm:$0xff]  }
 0x998   :  { %2669 = vmatpush1.bf16.msra.mxu1 %v3458_v48  ;;  %2751 = vmatpush1.bf16.msra.mxu0 %v3461_v4  ;;  %v3549_v48 = vld [vmem:[#allocation5 + $0x330] ss:$8 sps:$4 sm:$0xff]   ;;  %v3554_v4 = vld [vmem:[#allocation5 + $0x144] ss:$8 sps:$4 sm:$0xff]  }
 0x999   :  { %2670 = vmatprep.subr.bf16.mxu1 %v3466_v1  ;;  %2752 = vmatprep.subr.bf16.mxu0 %v3469_v54  ;;  %v3557_v1 = vld [vmem:[#allocation5 + $0x344] ss:$8 sps:$4 sm:$0xff]   ;;  %v3552_v54 = vld [vmem:[#allocation5 + $0x140] ss:$8 sps:$4 sm:$0xff]  }
 0x99c   :  { %2671 = vmatpush1.bf16.msra.mxu1 %v3464_v5  ;;  %2753 = vmatpush1.bf16.msra.mxu0 %v3467_v7  ;;  %v3555_v5 = vld [vmem:[#allocation5 + $0x340] ss:$8 sps:$4 sm:$0xff]   ;;  %v3560_v7 = vld [vmem:[#allocation5 + $0x154] ss:$8 sps:$4 sm:$0xff]  }
 0x99d   :  { %2672 = vmatprep.subr.bf16.mxu1 %v3472_v63  ;;  %2754 = vmatprep.subr.bf16.mxu0 %v3475_v22  ;;  %v3563_v63 = vld [vmem:[#allocation5 + $0x354] ss:$8 sps:$4 sm:$0xff]   ;;  %v3558_v22 = vld [vmem:[#allocation5 + $0x150] ss:$8 sps:$4 sm:$0xff]  }
 0x9a0   :  { %2673 = vmatpush1.bf16.msra.mxu1 %v3470_v44  ;;  %2755 = vmatpush1.bf16.msra.mxu0 %v3473_v45  ;;  %v3561_v44 = vld [vmem:[#allocation5 + $0x350] ss:$8 sps:$4 sm:$0xff]   ;;  %v3566_v45 = vld [vmem:[#allocation5 + $0x164] ss:$8 sps:$4 sm:$0xff]  }
 0x9a1   :  { %2674 = vmatprep.subr.bf16.mxu1 %v3478_v31  ;;  %2756 = vmatprep.subr.bf16.mxu0 %v3481_v6  ;;  %v3569_v31 = vld [vmem:[#allocation5 + $0x364] ss:$8 sps:$4 sm:$0xff]   ;;  %v3564_v6 = vld [vmem:[#allocation5 + $0x160] ss:$8 sps:$4 sm:$0xff]  }
 0x9a4   :  { %2675 = vmatpush1.bf16.msra.mxu1 %v3476_v9  ;;  %2757 = vmatpush1.bf16.msra.mxu0 %v3479_v10  ;;  %v3567_v9 = vld [vmem:[#allocation5 + $0x360] ss:$8 sps:$4 sm:$0xff]   ;;  %v3572_v10 = vld [vmem:[#allocation5 + $0x174] ss:$8 sps:$4 sm:$0xff]  }
 0x9a5   :  { %2676 = vmatprep.subr.bf16.mxu1 %v3484_v11  ;;  %2758 = vmatprep.subr.bf16.mxu0 %v3487_v14  ;;  %v3575_v11 = vld [vmem:[#allocation5 + $0x374] ss:$8 sps:$4 sm:$0xff]   ;;  %v3570_v14 = vld [vmem:[#allocation5 + $0x170] ss:$8 sps:$4 sm:$0xff]  }
 0x9a8   :  { %2677 = vmatpush1.bf16.msra.mxu1 %v3482_v15  ;;  %2759 = vmatpush1.bf16.msra.mxu0 %v3485_v16  ;;  %v3573_v15 = vld [vmem:[#allocation5 + $0x370] ss:$8 sps:$4 sm:$0xff]   ;;  %v3578_v16 = vld [vmem:[#allocation5 + $0x184] ss:$8 sps:$4 sm:$0xff]  }
 0x9a9   :  { %2678 = vmatprep.subr.bf16.mxu1 %v3490_v17  ;;  %2760 = vmatprep.subr.bf16.mxu0 %v3493_v43  ;;  %v3581_v17 = vld [vmem:[#allocation5 + $0x384] ss:$8 sps:$4 sm:$0xff]   ;;  %v3576_v43 = vld [vmem:[#allocation5 + $0x180] ss:$8 sps:$4 sm:$0xff]  }
 0x9ac   :  { %2679 = vmatpush1.bf16.msra.mxu1 %v3488_v60  ;;  %2761 = vmatpush1.bf16.msra.mxu0 %v3491_v47  ;;  %v3579_v60 = vld [vmem:[#allocation5 + $0x380] ss:$8 sps:$4 sm:$0xff]   ;;  %v3584_v47 = vld [vmem:[#allocation5 + $0x194] ss:$8 sps:$4 sm:$0xff]  }
 0x9ad   :  { %2680 = vmatprep.subr.bf16.mxu1 %v3496_v49  ;;  %2762 = vmatprep.subr.bf16.mxu0 %v3499_v52  ;;  %v3587_v49 = vld [vmem:[#allocation5 + $0x394] ss:$8 sps:$4 sm:$0xff]   ;;  %v3582_v52 = vld [vmem:[#allocation5 + $0x190] ss:$8 sps:$4 sm:$0xff]  }
 0x9b0   :  { %2681 = vmatpush1.bf16.msra.mxu1 %v3494_v55  ;;  %2763 = vmatpush1.bf16.msra.mxu0 %v3497_v51  ;;  %v3585_v55 = vld [vmem:[#allocation5 + $0x390] ss:$8 sps:$4 sm:$0xff]   ;;  %v3590_v51 = vld [vmem:[#allocation5 + $0x1a4] ss:$8 sps:$4 sm:$0xff]  }
 0x9b1   :  { %2682 = vmatprep.subr.bf16.mxu1 %v3502_v2  ;;  %2764 = vmatprep.subr.bf16.mxu0 %v3505_v58  ;;  %v3593_v2 = vld [vmem:[#allocation5 + $0x3a4] ss:$8 sps:$4 sm:$0xff]   ;;  %v3588_v58 = vld [vmem:[#allocation5 + $0x1a0] ss:$8 sps:$4 sm:$0xff]  }
 0x9b4   :  { %2683 = vmatpush1.bf16.msra.mxu1 %v3500_v42  ;;  %2765 = vmatpush1.bf16.msra.mxu0 %v3503_v3  ;;  %v3591_v42 = vld [vmem:[#allocation5 + $0x3a0] ss:$8 sps:$4 sm:$0xff]   ;;  %v3596_v3 = vld [vmem:[#allocation5 + $0x1b4] ss:$8 sps:$4 sm:$0xff]  }
 0x9b5   :  { %2684 = vmatprep.subr.bf16.mxu1 %v3508_v27  ;;  %2766 = vmatprep.subr.bf16.mxu0 %v3511_v28  ;;  %v3599_v27 = vld [vmem:[#allocation5 + $0x3b4] ss:$8 sps:$4 sm:$0xff]   ;;  %v3594_v28 = vld [vmem:[#allocation5 + $0x1b0] ss:$8 sps:$4 sm:$0xff]  }
 0x9b8   :  { %2685 = vmatpush1.bf16.msra.mxu1 %v3506_v29  ;;  %2767 = vmatpush1.bf16.msra.mxu0 %v3509_v30  ;;  %v3597_v29 = vld [vmem:[#allocation5 + $0x3b0] ss:$8 sps:$4 sm:$0xff]   ;;  %v3602_v30 = vld [vmem:[#allocation5 + $0x1c4] ss:$8 sps:$4 sm:$0xff]  }
 0x9b9   :  { %2686 = vmatprep.subr.bf16.mxu1 %v3514_v56  ;;  %2768 = vmatprep.subr.bf16.mxu0 %v3517_v21  ;;  %v3605_v56 = vld [vmem:[#allocation5 + $0x3c4] ss:$8 sps:$4 sm:$0xff]   ;;  %v3600_v21 = vld [vmem:[#allocation5 + $0x1c0] ss:$8 sps:$4 sm:$0xff]  }
 0x9bc   :  { %2687 = vmatpush1.bf16.msra.mxu1 %v3512_v50  ;;  %2769 = vmatpush1.bf16.msra.mxu0 %v3515_v0  ;;  %v3603_v50 = vld [vmem:[#allocation5 + $0x3c0] ss:$8 sps:$4 sm:$0xff]   ;;  %v3608_v0 = vld [vmem:[#allocation5 + $0x1d4] ss:$8 sps:$4 sm:$0xff]  }
 0x9bd   :  { %2688 = vmatprep.subr.bf16.mxu1 %v3520_v46  ;;  %2770 = vmatprep.subr.bf16.mxu0 %v3523_v62  ;;  %v3611_v46 = vld [vmem:[#allocation5 + $0x3d4] ss:$8 sps:$4 sm:$0xff]   ;;  %v3606_v62 = vld [vmem:[#allocation5 + $0x1d0] ss:$8 sps:$4 sm:$0xff]  }
 0x9c0   :  { %2689 = vmatpush1.bf16.msra.mxu1 %v3518_v24  ;;  %2771 = vmatpush1.bf16.msra.mxu0 %v3521_v25  ;;  %v3609_v24 = vld [vmem:[#allocation5 + $0x3d0] ss:$8 sps:$4 sm:$0xff]   ;;  %v3614_v25 = vld [vmem:[#allocation5 + $0x1e4] ss:$8 sps:$4 sm:$0xff]  }
 0x9c1   :  { %2699 = vmatprep.subr.bf16.mxu1 %v3526_v13  ;;  %2781 = vmatprep.subr.bf16.mxu0 %v3529_v57  ;;  %v3617_v13 = vld [vmem:[#allocation5 + $0x3e4] ss:$8 sps:$4 sm:$0xff]   ;;  %v3612_v57 = vld [vmem:[#allocation5 + $0x1e0] ss:$8 sps:$4 sm:$0xff]  }
 0x9c3   :  { %2691 = vmatmul.mubr.bf16.vlgmr.msra.gmra.mrb[64].mxu1 %v3128_v26  ;;  %2773 = vmatmul.mubr.bf16.vlgmr.msra.gmra.mrb[56].mxu0 %v3132_v32  ;;  %v3620_v26 = vld [vmem:[#allocation5 + $0x1f4] ss:$8 sps:$4 sm:$0xff]  }
 0x9c4   :  { %2700 = vmatpush1.bf16.msra.mxu1 %v3524_v61  ;;  %2731 = vmatprep.mubr.bf16.mxu1 %v3131_v34  ;;  %v3615_v61 = vld [vmem:[#allocation5 + $0x3e0] ss:$8 sps:$4 sm:$0xff]   ;;  %v3623_v32 = vld [vmem:[#allocation5 + $0x3f4] ss:$8 sps:$4 sm:$0xff]   ;;  %v3621_v34 = vld [vmem:[#allocation5 + $0x3f0] ss:$8 sps:$4 sm:$0xff]  }
 0x9c5   :  { %2782 = vmatpush1.bf16.msra.mxu0 %v3527_v33  ;;  %2813 = vmatprep.mubr.bf16.mxu0 %v3135_v37  ;;  %v3618_v33 = vld [vmem:[#allocation5 + $0x1f0] ss:$8 sps:$4 sm:$0xff]   ;;  %v3624_v37 = vld [vmem:[#allocation5 + $0x400] ss:$8 sps:$4 sm:$0xff]  }
 0x9c6   :  { %2701 = vmatprep.subr.bf16.mxu1 %v3536_v35  ;;  %2783 = vmatprep.subr.bf16.mxu0 %v3539_v36  ;;  %v3626_v35 = vld [vmem:[#allocation5 + $0x404] ss:$8 sps:$4 sm:$0xff]   ;;  %v3130_v36 = vcombine.low %v4784_v53, %v4784_v53 }
 0x9c7   :  { %v3638_v53 = vld [vmem:[#allocation5 + $0x444] ss:$8 sps:$4 sm:$0xff]  }
 0x9c8   :  { %2702 = vmatpush1.bf16.msra.mxu1 %v3534_v38  ;;  %v3134_v38 = vcombine.low %v4786_v8, %v4786_v8  ;;  %v3641_v8 = vld [vmem:[#allocation5 + $0x454] ss:$8 sps:$4 sm:$0xff]  }
 0x9c9   :  { %2784 = vmatpush1.bf16.msra.mxu0 %v3537_v59  ;;  %2703 = vmatprep.subr.bf16.mxu1 %v3542_v23  ;;  %v3629_v59 = vld [vmem:[#allocation5 + $0x414] ss:$8 sps:$4 sm:$0xff]   ;;  %v3627_v23 = vld [vmem:[#allocation5 + $0x410] ss:$8 sps:$4 sm:$0xff]  }
 0x9ca   :  { %2785 = vmatprep.subr.bf16.mxu0 %v3545_v39  ;;  %v3632_v39 = vld [vmem:[#allocation5 + $0x424] ss:$8 sps:$4 sm:$0xff]  }
 0x9cc   :  { %2704 = vmatpush1.bf16.msra.mxu1 %v3540_v40  ;;  %v3630_v40 = vld [vmem:[#allocation5 + $0x420] ss:$8 sps:$4 sm:$0xff]  }
 0x9cd   :  { %2786 = vmatpush1.bf16.msra.mxu0 %v3543_v41  ;;  %2705 = vmatprep.subr.bf16.mxu1 %v3548_v18  ;;  %v3635_v41 = vld [vmem:[#allocation5 + $0x434] ss:$8 sps:$4 sm:$0xff]   ;;  %v3633_v18 = vld [vmem:[#allocation5 + $0x430] ss:$8 sps:$4 sm:$0xff]  }
 0x9ce   :  { %2787 = vmatprep.subr.bf16.mxu0 %v3551_v19  ;;  %v3636_v19 = vld [vmem:[#allocation5 + $0x440] ss:$8 sps:$4 sm:$0xff]  }
 0x9d0   :  { %2706 = vmatpush1.bf16.msra.mxu1 %v3546_v20  ;;  %v3639_v20 = vld [vmem:[#allocation5 + $0x450] ss:$8 sps:$4 sm:$0xff]  }
 0x9d1   :  { %2788 = vmatpush1.bf16.msra.mxu0 %v3549_v48  ;;  %2707 = vmatprep.subr.bf16.mxu1 %v3554_v4  ;;  %v3644_v48 = vld [vmem:[#allocation5 + $0x464] ss:$8 sps:$4 sm:$0xff]   ;;  %v3642_v4 = vld [vmem:[#allocation5 + $0x460] ss:$8 sps:$4 sm:$0xff]  }
 0x9d2   :  { %2789 = vmatprep.subr.bf16.mxu0 %v3557_v1  ;;  %v3647_v1 = vld [vmem:[#allocation5 + $0x474] ss:$8 sps:$4 sm:$0xff]  }
 0x9d4   :  { %2708 = vmatpush1.bf16.msra.mxu1 %v3552_v54  ;;  %v3645_v54 = vld [vmem:[#allocation5 + $0x470] ss:$8 sps:$4 sm:$0xff]  }
 0x9d5   :  { %2790 = vmatpush1.bf16.msra.mxu0 %v3555_v5  ;;  %2709 = vmatprep.subr.bf16.mxu1 %v3560_v7  ;;  %v3650_v5 = vld [vmem:[#allocation5 + $0x484] ss:$8 sps:$4 sm:$0xff]   ;;  %v3648_v7 = vld [vmem:[#allocation5 + $0x480] ss:$8 sps:$4 sm:$0xff]  }
 0x9d6   :  { %2791 = vmatprep.subr.bf16.mxu0 %v3563_v63  ;;  %v3653_v63 = vld [vmem:[#allocation5 + $0x494] ss:$8 sps:$4 sm:$0xff]  }
 0x9d8   :  { %2710 = vmatpush1.bf16.msra.mxu1 %v3558_v22  ;;  %v3651_v22 = vld [vmem:[#allocation5 + $0x490] ss:$8 sps:$4 sm:$0xff]  }
 0x9d9   :  { %2792 = vmatpush1.bf16.msra.mxu0 %v3561_v44  ;;  %2711 = vmatprep.subr.bf16.mxu1 %v3566_v45  ;;  %v3656_v44 = vld [vmem:[#allocation5 + $0x4a4] ss:$8 sps:$4 sm:$0xff]   ;;  %v3654_v45 = vld [vmem:[#allocation5 + $0x4a0] ss:$8 sps:$4 sm:$0xff]  }
 0x9da   :  { %2793 = vmatprep.subr.bf16.mxu0 %v3569_v31  ;;  %v3659_v31 = vld [vmem:[#allocation5 + $0x4b4] ss:$8 sps:$4 sm:$0xff]  }
 0x9dc   :  { %2712 = vmatpush1.bf16.msra.mxu1 %v3564_v6  ;;  %v3657_v6 = vld [vmem:[#allocation5 + $0x4b0] ss:$8 sps:$4 sm:$0xff]  }
 0x9dd   :  { %2794 = vmatpush1.bf16.msra.mxu0 %v3567_v9  ;;  %2713 = vmatprep.subr.bf16.mxu1 %v3572_v10  ;;  %v3662_v9 = vld [vmem:[#allocation5 + $0x4c4] ss:$8 sps:$4 sm:$0xff]   ;;  %v3660_v10 = vld [vmem:[#allocation5 + $0x4c0] ss:$8 sps:$4 sm:$0xff]  }
 0x9de   :  { %2795 = vmatprep.subr.bf16.mxu0 %v3575_v11  ;;  %v3665_v11 = vld [vmem:[#allocation5 + $0x4d4] ss:$8 sps:$4 sm:$0xff]  }
 0x9e0   :  { %2714 = vmatpush1.bf16.msra.mxu1 %v3570_v14  ;;  %v3663_v14 = vld [vmem:[#allocation5 + $0x4d0] ss:$8 sps:$4 sm:$0xff]  }
 0x9e1   :  { %2796 = vmatpush1.bf16.msra.mxu0 %v3573_v15  ;;  %2715 = vmatprep.subr.bf16.mxu1 %v3578_v16  ;;  %v3668_v15 = vld [vmem:[#allocation5 + $0x4e4] ss:$8 sps:$4 sm:$0xff]   ;;  %v3666_v16 = vld [vmem:[#allocation5 + $0x4e0] ss:$8 sps:$4 sm:$0xff]  }
 0x9e2   :  { %2797 = vmatprep.subr.bf16.mxu0 %v3581_v17  ;;  %v3671_v17 = vld [vmem:[#allocation5 + $0x4f4] ss:$8 sps:$4 sm:$0xff]  }
 0x9e4   :  { %2716 = vmatpush1.bf16.msra.mxu1 %v3576_v43  ;;  %v3669_v43 = vld [vmem:[#allocation5 + $0x4f0] ss:$8 sps:$4 sm:$0xff]  }
 0x9e5   :  { %2798 = vmatpush1.bf16.msra.mxu0 %v3579_v60  ;;  %2717 = vmatprep.subr.bf16.mxu1 %v3584_v47 }
 0x9e6   :  { %2799 = vmatprep.subr.bf16.mxu0 %v3587_v49  ;;  %v4879_v49 = vld [vmem:[#allocation13_spill] sm:$0xff] }
 0x9e8   :  { %2718 = vmatpush1.bf16.msra.mxu1 %v3582_v52 }
 0x9e9   :  { %2800 = vmatpush1.bf16.msra.mxu0 %v3585_v55  ;;  %2719 = vmatprep.subr.bf16.mxu1 %v3590_v51  ;;  %v4880_v55 = vld [vmem:[#allocation33_spill] sm:$0xff] }
 0x9ea   :  { %2801 = vmatprep.subr.bf16.mxu0 %v3593_v2 }
 0x9ec   :  { %2720 = vmatpush1.bf16.msra.mxu1 %v3588_v58 }
 0x9ed   :  { %2802 = vmatpush1.bf16.msra.mxu0 %v3591_v42  ;;  %2721 = vmatprep.subr.bf16.mxu1 %v3596_v3  ;;  %v4881_v42 = vld [vmem:[#allocation14_spill] sm:$0xff] }
 0x9ee   :  { %2803 = vmatprep.subr.bf16.mxu0 %v3599_v27  ;;  %v4882_v27 = vld [vmem:[#allocation34_spill] sm:$0xff] }
 0x9f0   :  { %2722 = vmatpush1.bf16.msra.mxu1 %v3594_v28 }
 0x9f1   :  { %2804 = vmatpush1.bf16.msra.mxu0 %v3597_v29  ;;  %2723 = vmatprep.subr.bf16.mxu1 %v3602_v30 }
 0x9f2   :  { %2805 = vmatprep.subr.bf16.mxu0 %v3605_v56 }
 0x9f4   :  { %2724 = vmatpush1.bf16.msra.mxu1 %v3600_v21 }
 0x9f5   :  { %2806 = vmatpush1.bf16.msra.mxu0 %v3603_v50  ;;  %2725 = vmatprep.subr.bf16.mxu1 %v3608_v0  ;;  %v3674_v0 = vld [vmem:[#allocation7 + $0x40] sm:$0xff]  }
 0x9f6   :  { %2807 = vmatprep.subr.bf16.mxu0 %v3611_v46  ;;  %v3675_v46 = vld [vmem:[#allocation7] sm:$0xff]  }
 0x9f8   :  { %2726 = vmatpush1.bf16.msra.mxu1 %v3606_v62 }
 0x9f9   :  { %2808 = vmatpush1.bf16.msra.mxu0 %v3609_v24  ;;  %2727 = vmatprep.subr.bf16.mxu1 %v3614_v25  ;;  %v3676_v24 = vld [vmem:[#allocation7 + $0x48] sm:$0xff]  }
 0x9fa   :  { %2809 = vmatprep.subr.bf16.mxu0 %v3617_v13  ;;  %v3677_v25 = vld [vmem:[#allocation7 + $0x8] sm:$0xff]   ;;  %v3678_v13 = vld [vmem:[#allocation7 + $0x50] sm:$0xff]  }
 0x9fc   :  { %2728 = vmatpush1.bf16.msra.mxu1 %v3612_v57  ;;  %v3679_v57 = vld [vmem:[#allocation7 + $0x10] sm:$0xff]  }
 0x9fd   :  { %2810 = vmatpush1.bf16.msra.mxu0 %v3615_v61  ;;  %2729 = vmatprep.subr.bf16.mxu1 %v3620_v26  ;;  %v3680_v61 = vld [vmem:[#allocation7 + $0x58] sm:$0xff]  }
 0x9fe   :  { %2811 = vmatprep.subr.bf16.mxu0 %v3623_v32  ;;  %v3681_v32 = vld [vmem:[#allocation7 + $0x18] sm:$0xff]  }
 0xa00   :  { %2730 = vmatpush1.bf16.msra.mxu1 %v3618_v33 }
 0xa01   :  { %2812 = vmatpush1.bf16.msra.mxu0 %v3621_v34  ;;  %3315 = vmatprep.subr.bf16.mxu1 %v3674_v0  ;;  %v3682_v34 = vld [vmem:[#allocation7 + $0x60] sm:$0xff]  }
 0xa02   :  { %2822 = vmatprep.subr.bf16.mxu0 %v3626_v35 }
 0xa03   :  { %2732 = vmatmul.mubr.bf16.vlgmr.msra.gmra.mrb[64].mxu1 %v3130_v36 }
 0xa04   :  { %2814 = vmatmul.mubr.bf16.vlgmr.msra.gmra.mrb[56].mxu0 %v3134_v38  ;;  %3316 = vmatpush3.bf16.msra.mxu1 %v3675_v46  ;;  %v3683_v38 = vld [vmem:[#allocation7 + $0x20] sm:$0xff]  }
 0xa05   :  { %2823 = vmatpush1.bf16.msra.mxu0 %v3624_v37  ;;  %3317 = vmatprep.subr.bf16.mxu1 %v3676_v24 }
 0xa06   :  { %2824 = vmatprep.subr.bf16.mxu0 %v3629_v59  ;;  %v3684_v59 = vld [vmem:[#allocation7 + $0x68] sm:$0xff]  }
 0xa08   :  { %3318 = vmatpush3.bf16.msra.mxu1 %v3677_v25 }
 0xa09   :  { %2825 = vmatpush1.bf16.msra.mxu0 %v3627_v23  ;;  %3319 = vmatprep.subr.bf16.mxu1 %v3678_v13  ;;  %v3685_v23 = vld [vmem:[#allocation7 + $0x28] sm:$0xff]  }
 0xa0a   :  { %2826 = vmatprep.subr.bf16.mxu0 %v3632_v39  ;;  %v3686_v39 = vld [vmem:[#allocation7 + $0x70] sm:$0xff]  }
 0xa0c   :  { %3320 = vmatpush3.bf16.msra.mxu1 %v3679_v57 }
 0xa0d   :  { %2827 = vmatpush1.bf16.msra.mxu0 %v3630_v40  ;;  %3321 = vmatprep.subr.bf16.mxu1 %v3680_v61 }
 0xa0e   :  { %2828 = vmatprep.subr.bf16.mxu0 %v3635_v41 }
 0xa10   :  { %3322 = vmatpush3.bf16.msra.mxu1 %v3681_v32 }
 0xa11   :  { %2829 = vmatpush1.bf16.msra.mxu0 %v3633_v18  ;;  %3323 = vmatprep.subr.bf16.mxu1 %v3682_v34 }
 0xa12   :  { %2830 = vmatprep.subr.bf16.mxu0 %v3638_v53 }
 0xa14   :  { %3324 = vmatpush3.bf16.msra.mxu1 %v3683_v38 }
 0xa15   :  { %2831 = vmatpush1.bf16.msra.mxu0 %v3636_v19  ;;  %3325 = vmatprep.subr.bf16.mxu1 %v3684_v59 }
 0xa16   :  { %2832 = vmatprep.subr.bf16.mxu0 %v3641_v8 }
 0xa18   :  { %3326 = vmatpush3.bf16.msra.mxu1 %v3685_v23 }
 0xa19   :  { %2833 = vmatpush1.bf16.msra.mxu0 %v3639_v20  ;;  %3327 = vmatprep.subr.bf16.mxu1 %v3686_v39 }
 0xa1a   :  { %2834 = vmatprep.subr.bf16.mxu0 %v3644_v48 }
 0xa1d   :  { %2835 = vmatpush1.bf16.msra.mxu0 %v3642_v4 }
 0xa1e   :  { %2836 = vmatprep.subr.bf16.mxu0 %v3647_v1 }
 0xa21   :  { %2837 = vmatpush1.bf16.msra.mxu0 %v3645_v54 }
 0xa22   :  { %2838 = vmatprep.subr.bf16.mxu0 %v3650_v5 }
 0xa25   :  { %2839 = vmatpush1.bf16.msra.mxu0 %v3648_v7 }
 0xa26   :  { %2840 = vmatprep.subr.bf16.mxu0 %v3653_v63 }
 0xa29   :  { %2841 = vmatpush1.bf16.msra.mxu0 %v3651_v22 }
 0xa2a   :  { %2842 = vmatprep.subr.bf16.mxu0 %v3656_v44 }
 0xa2d   :  { %2843 = vmatpush1.bf16.msra.mxu0 %v3654_v45 }
 0xa2e   :  { %2844 = vmatprep.subr.bf16.mxu0 %v3659_v31 }
 0xa31   :  { %2845 = vmatpush1.bf16.msra.mxu0 %v3657_v6 }
 0xa32   :  { %2846 = vmatprep.subr.bf16.mxu0 %v3662_v9  ;;  %v3687_v9 = vld [vmem:[#allocation7 + $0x30] sm:$0xff]  }
 0xa33   :  { %3328 = vmatpush3.bf16.msra.mxu1 %v3687_v9 }
 0xa35   :  { %2847 = vmatpush1.bf16.msra.mxu0 %v3660_v10  ;;  %v3689_v10 = vld [vmem:[#allocation7 + $0x38] sm:$0xff]  }
 0xa36   :  { %2848 = vmatprep.subr.bf16.mxu0 %v3665_v11  ;;  %v1811_v11 = vld [vmem:[%s4823_s5] sm:$0x3] }
 0xa39   :  { %2849 = vmatpush1.bf16.msra.mxu0 %v3663_v14  ;;  %v4883_v14 = vld [vmem:[#allocation10_spill] sm:$0xff] }
 0xa3a   :  { %2850 = vmatprep.subr.bf16.mxu0 %v3668_v15  ;;  %v4884_v15 = vsub.s32 0, %v4883_v14 }
 0xa3d   :  { %2851 = vmatpush1.bf16.msra.mxu0 %v3666_v16  ;;  %v1816_v16 = vrot.slane %v1811_v11, %v4884_v15 }
 0xa3e   :  { %2852 = vmatprep.subr.bf16.mxu0 %v3671_v17  ;;  %v4885_v17 = vsub.s32 1, %v4883_v14 }
 0xa41   :  { %2853 = vmatpush1.bf16.msra.mxu0 %v3669_v43  ;;  %v1820_v43 = vrot.slane %v1811_v11, %v4885_v17 }
 0xa56   :  { %v1568_v60 = vpop.f32.mrb[52].mxu0  ;;  %v1609_v47 = vpop.f32.mrb[60].mxu1 }
 0xa57   :  { %v1616_v52 = vadd.f32 %v1568_v60, %v4879_v49  ;;  %v1618_v51 = vadd.f32 %v1609_v47, %v4880_v55  ;;  %v1570_v2 = vpop.f32.mrb[53].mxu0  ;;  %v1611_v58 = vpop.f32.mrb[61].mxu1 }
 0xa58   :  { %v1617_v3 = vadd.f32 %v1570_v2, %v4881_v42  ;;  %v1619_v28 = vadd.f32 %v1611_v58, %v4882_v27  ;;  %v1572_v29 = vpop.f32.mrb[54].mxu0  ;;  %v1613_v30 = vpop.f32.mrb[62].mxu1 }
 0xa59   :  { %v3125_v56 = vmul.f32 -1.442695, %v1616_v52  ;;  %v1573_v21 = vpop.f32.mrb[55].mxu0  ;;  %v1614_v50 = vpop.f32.mrb[63].mxu1 }
 0xa5a   :  { %v3126_v62 = vmul.f32 -1.442695, %v1617_v3  ;;  %v3127_v26 = vmul.f32 -1.442695, %v1619_v28  ;;  %v3298_v28 = vld [vmem:[%s4825_s7] ss:$0 sm:$0xff] }
 0xa5b   :  { %3834 = vpow2.f32 %v3125_v56 }
 0xa5c   :  { %3836 = vpow2.f32 %v3126_v62 }
 0xa5d   :  { %3838 = vpow2.f32 %v3127_v26 }
 0xa5e   :  { %3840 = vtanh.f32 %v1618_v51 }
 0xa65   :  { %v3835_v33 = vpop.eup %3834 }
 0xa66   :  { %v3837_v35 = vpop.eup %3836  ;;  %v1623_v36 = vadd.f32 1.0, %v3835_v33 }
 0xa67   :  { %v1629_v37 = vadd.f32 1.0, %v3837_v35  ;;  %v3839_v40 = vpop.eup %3838 }
 0xa68   :  { %3842 = vrcp.f32 %v1623_v36  ;;  %v3841_v41 = vpop.eup %3840  ;;  %v1636_v8 = vadd.f32 1.0, %v3839_v40 }
 0xa69   :  { %3844 = vrcp.f32 %v1629_v37 }
 0xa6a   :  { %3846 = vrcp.f32 %v1636_v8 }
 0xa72   :  { %v3843_v18 = vpop.eup %3842 }
 0xa73   :  { %v3845_v53 = vpop.eup %3844  ;;  %v1640_v19 = vmul.f32 %v3843_v18, %v3841_v41 }
 0xa74   :  { %v1639_v20 = vmul.f32 %v3845_v53, %v4773_v12  ;;  %v3847_v4 = vpop.eup %3846  ;;  %v3688_v12 = vld [vmem:[#allocation7 + $0x78] sm:$0xff]  }
 0xa75   :  { %3329 = vmatprep.subr.bf16.mxu1 %v3688_v12 }
 0xa76   :  { %v1641_v48 = vadd.f32 %v1640_v19, %v1639_v20  ;;  %3330 = vmatpush3.bf16.msra.mxu1 %v3689_v10 }
 0xa78   :  { %3848 = vtanh.f32 %v1641_v48 }
 0xa82   :  { %v3849_v1 = vpop.eup %3848 }
 0xa83   :  { %v1643_v54 = vmul.f32 %v3849_v1, %v3847_v4 }
 0xa85   :  { %v1644_v5 = vpack.c.bf16 %v1643_v54, %v1643_v54 }
 0xa87   :  { %1645 = vst [vmem:[#allocation2 + $0x24] sm:$0xf] %v1644_v5 }
 0xa8e   :  { %v1650_v7 = vld [vmem:[#allocation2 + $0x20] sm:$0xff] }
 0xa8f   :  { %v3136_v63 = vcombine.low %v1650_v7, %v1650_v7  ;;  %v3137_v22 = vcombine.high %v1650_v7, %v1650_v7 }
 0xa91   :  { %2854 = vmatprep.mubr.bf16.mxu0 %v3137_v22 }
 0xa92   :  { %2855 = vmatmul.mubr.bf16.vlgmr.msra.gmra.mrb[56].mxu0 %v3136_v63 }
 0xad6   :  { %v2733_v44 = vpop.f32.mrb[64].mxu1 }
 0xad7   :  { %v2735_v45 = vpop.f32.mrb[65].mxu1  ;;  %v3339_v60 = vadd.f32 %v2733_v44, %v1816_v16 }
 0xad8   :  { %v2737_v31 = vpop.f32.mrb[66].mxu1  ;;  %v3341_v47 = vadd.f32 %v2735_v45, %v1820_v43 }
 0xad9   :  { %v2738_v6 = vpop.f32.mrb[67].mxu1 }
 0xb65   :  { %v2856_v49 = vpop.f32.mrb[56].mxu0 }
 0xb66   :  { %v3340_v52 = vadd.f32 %v3339_v60, %v2856_v49  ;;  %v2858_v55 = vpop.f32.mrb[57].mxu0 }
 0xb67   :  { %v3342_v51 = vadd.f32 %v3341_v47, %v2858_v55  ;;  %v2860_v2 = vpop.f32.mrb[58].mxu0 }
 0xb68   :  { %v2861_v58 = vpop.f32.mrb[59].mxu0  ;;  %v2863_v3 = vpack.c.bf16 %v3340_v52, %v3340_v52 }
 0xb69   :  { %v2864_v42 = vpack.c.bf16 %v3342_v51, %v3342_v51 }
 0xb6b   :  { %3032 = vmatprep.mubr.bf16.mxu1 %v2864_v42 }
 0xb6c   :  { %3033 = vmatmul.mubr.bf16.vlgmr.msra.gmra.mrb[68].mxu1 %v2863_v3 }
 0xc3f   :  { %v3331_v27 = vpop.f32.mrb[68].mxu1 }
 0xc40   :  { %v3332_v29 = vpop.f32.mrb[69].mxu1 }
 0xc41   :  { %v3333_v30 = vadd.f32 %v3332_v29, %v3331_v27  ;;  %v3334_v56 = vpop.f32.mrb[70].mxu1 }
 0xc42   :  { %v3335_v21 = vpop.f32.mrb[71].mxu1 }
 0xc43   :  { %v3035_v50 = vadd.f32 %v3333_v30, %v3298_v28 }
 0xc45   :  { %3040 = vst [vmem:[%s4826_s8] sm:$0xff] %v3035_v50 }
 0xc46   :  { %3045 = vsyncpa [#allocation4], 1 }
 0xc47   :  { %3046 = vsyncpa [#allocation6], 1 }

</bundles_post_ra>
